<compile_context>
chip_gen: v7x
topology: tpu7x:2x2x1
jax: 0.10.0
libtpu: 0.0.40
codegen_flags: <defaults>
</compile_context>

<pallas_src>
import jax
import jax.numpy as jnp
from jax.experimental import pallas as pl
from jax.experimental.pallas import tpu as pltpu


def _round_up(a, b):
    return (a + b - 1) // b * b


# ----------------------------------------------------------------------------
# Kernels
# ----------------------------------------------------------------------------
def _swiglu_partial(x, wgu, wd):
    """One I-tile of SwiGLU. x:(tm,H), wgu:(2*ti,H), wd:(H,ti) -> (tm,H) f32."""
    ti = wgu.shape[0] // 2

    # Fused gate+up projection: one wide MXU matmul, contracting both H axes
    # (weights stay in native nn.Linear (I, H) layout -> no host transposes).
    gu = jax.lax.dot_general(
        x, wgu,
        dimension_numbers=(((1,), (1,)), ((), ())),
        preferred_element_type=jnp.float32)          # (tm, 2*ti), f32
    gate = gu[:, :ti]                                # ti is a multiple of 128
    up = gu[:, ti:]

    # Numerically stable SiLU in f32 (no overflow, exact divide).
    e = jnp.exp(-jnp.abs(gate))                      # in (0, 1], never inf
    r = 1.0 / (1.0 + e)
    sig = jnp.where(gate >= 0, r, e * r)
    hidden = (gate * sig * up).astype(wd.dtype)      # (tm, ti)

    # Down projection for this I-tile (native (H, I) layout), f32 accumulate.
    return jax.lax.dot_general(
        hidden, wd,
        dimension_numbers=(((1,), (1,)), ((), ())),
        preferred_element_type=jnp.float32)          # (tm, H)


def _mlp_kernel_resident(x_ref, wgu_ref, wd_ref, o_ref):
    """Weights fully VMEM-resident (n_k == 1): no accumulator round-trip."""
    o_ref[...] = _swiglu_partial(
        x_ref[...], wgu_ref[...], wd_ref[...]).astype(o_ref.dtype)


def _mlp_kernel_tiled(x_ref, wgu_ref, wd_ref, o_ref, acc_ref):
    """Weights streamed over the I axis; f32 accumulator across I tiles."""
    k = pl.program_id(1)

    @pl.when(k == 0)
    def _init():
        acc_ref[...] = jnp.zeros_like(acc_ref)

    acc_ref[...] += _swiglu_partial(x_ref[...], wgu_ref[...], wd_ref[...])

    @pl.when(k == pl.num_programs(1) - 1)
    def _store():
        o_ref[...] = acc_ref[...].astype(o_ref.dtype)


# ----------------------------------------------------------------------------
# Tile selection helpers
# ----------------------------------------------------------------------------
def _tpu_vmem_info():
    """(vmem_capacity_bytes, chip_name_str); conservative defaults on failure."""
    cap = 64 << 20
    name = ""
    try:
        info = pltpu.get_tpu_info()
        c = getattr(info, "vmem_capacity_bytes", None)
        if c:
            cap = int(c)
        name = str(getattr(info, "chip_version", "") or
                   getattr(info, "version", "") or "")
    except Exception:
        pass
    return cap, name


def _default_tiles(cap, chip_name):
    n = chip_name.lower()
    if cap <= (64 << 20):
        # v7x: 64 MiB VMEM / TC, both TCs re-stream weights -> smaller ti.
        return 512, 256
    if "v5" in n or "5e" in n or "5p" in n:
        # v5e roofline (~240 FLOP/B bf16) is already cleared at tm=256.
        return 256, 512
    # v6e (or unknown 128 MiB chip): tm >= ~640 needed to beat the bf16
    # weight-streaming roofline; 768 keeps the tile set well inside VMEM.
    return 768, 512


def _vmem_footprint(tm, ti, H, act_isz, w_isz):
    w_tiles = 2 * 3 * ti * H * w_isz            # gate+up (2ti,H) + down (H,ti), x2 buffers
    xo = 2 * 2 * tm * H * act_isz               # x and out tiles, double-buffered
    acc = tm * H * 4                            # f32 accumulator scratch
    temps = tm * 2 * ti * 4 + tm * ti * 4 + tm * ti * w_isz   # gu, silu*up, hidden
    return w_tiles + xo + acc + temps + (2 << 20)              # + internal scratch margin


def _choose_tiles(M, H, I_pad, act_isz, w_isz, tm_req, ti_req, budget):
    row_align = {4: 8, 2: 16, 1: 32}.get(act_isz, 8)
    tm = max(row_align, min(tm_req, _round_up(M, row_align)))
    tm = _round_up(tm, row_align)
    ti_req = max(128, ti_req)

    def ti_candidates(cap_ti):
        # multiples of 128 that divide I_pad, descending, <= cap_ti
        return sorted(
            (t for t in range(128, I_pad + 1, 128)
             if I_pad % t == 0 and t <= cap_ti),
            reverse=True)

    while True:
        # Prefer full weight residency (weights DMA'd exactly once).
        if _vmem_footprint(tm, I_pad, H, act_isz, w_isz) <= budget:
            return tm, I_pad
        for ti in ti_candidates(min(ti_req, I_pad)):
            if _vmem_footprint(tm, ti, H, act_isz, w_isz) <= budget:
                return tm, ti
        if tm <= row_align:
            return tm, 128          # last resort; I_pad is a multiple of 128
        tm = max(row_align, _round_up(tm // 2, row_align))


# ----------------------------------------------------------------------------
# Wrapper
# ----------------------------------------------------------------------------
def vishwamai_mlp(x, w_gate, w_up, w_down, *, tm=None, ti=None,
                  matmul_dtype=None, vmem_limit_bytes=None):
    """x: (B, S, H). w_gate/w_up: (I, H), w_down: (H, I) — native nn.Linear."""
    B, S, H = x.shape
    I = w_gate.shape[0]
    assert w_gate.shape == (I, H) and w_up.shape == (I, H)
    assert w_down.shape == (H, I)

    out_dtype = x.dtype
    if matmul_dtype is not None:
        # Optional lower-precision MXU inputs (e.g. bf16 for f32 checkpoints);
        # accumulation stays f32, output keeps the original activation dtype.
        x = x.astype(matmul_dtype)
        w_gate = w_gate.astype(matmul_dtype)
        w_up = w_up.astype(matmul_dtype)
        w_down = w_down.astype(matmul_dtype)

    act_isz = jnp.dtype(x.dtype).itemsize
    w_isz = jnp.dtype(w_gate.dtype).itemsize

    M = B * S
    x2d = x.reshape(M, H)

    # ---- pad intermediate dim so gate/up split & tiles are lane-aligned -----
    I_pad = _round_up(I, 128)
    if I_pad != I:
        w_gate = jnp.pad(w_gate, ((0, I_pad - I), (0, 0)))
        w_up = jnp.pad(w_up, ((0, I_pad - I), (0, 0)))
        w_down = jnp.pad(w_down, ((0, 0), (0, I_pad - I)))

    # ---- generation-aware, VMEM-aware tile selection -------------------------
    cap, chip = _tpu_vmem_info()
    tm_req, ti_req = _default_tiles(cap, chip)
    if tm is not None:
        tm_req = tm
    if ti is not None:
        ti_req = ti
    budget = int(0.75 * cap)
    tm, ti = _choose_tiles(M, H, I_pad, act_isz, w_isz, tm_req, ti_req, budget)
    n_k = I_pad // ti

    Mp = _round_up(M, tm)
    if Mp != M:
        x2d = jnp.pad(x2d, ((0, Mp - M), (0, 0)))
    n_m = Mp // tm

    # ---- pack gate+up so each I-tile is one contiguous (2*ti, H) slab --------
    # (In a real model this packing is done once at parameter-init time.)
    w_gu = jnp.concatenate(
        [w_gate.reshape(n_k, ti, H), w_up.reshape(n_k, ti, H)], axis=1
    ).reshape(2 * I_pad, H)

    footprint = _vmem_footprint(tm, ti, H, act_isz, w_isz)
    if vmem_limit_bytes is None:
        vmem_limit_bytes = int(min(cap, max(footprint + (8 << 20), 32 << 20)))

    # Weights are fetched once when resident (n_k == 1), else once per M tile.
    weight_reads = 1 if n_k == 1 else n_m
    cost = pl.CostEstimate(
        flops=6 * M * H * I,
        transcendentals=M * I,
        bytes_accessed=int(2 * M * H * act_isz
                           + weight_reads * 3 * H * I_pad * w_isz),
    )

    if n_k == 1:
        out2d = pl.pallas_call(
            _mlp_kernel_resident,
            out_shape=jax.ShapeDtypeStruct((Mp, H), out_dtype),
            grid_spec=pltpu.PrefetchScalarGridSpec(
                num_scalar_prefetch=0,
                grid=(n_m,),
                in_specs=[
                    pl.BlockSpec((tm, H), lambda i: (i, 0)),          # x rows
                    pl.BlockSpec((2 * I_pad, H), lambda i: (0, 0)),   # gate+up (resident)
                    pl.BlockSpec((H, I_pad), lambda i: (0, 0)),       # down (resident)
                ],
                out_specs=pl.BlockSpec((tm, H), lambda i: (i, 0)),
            ),
            compiler_params=pltpu.CompilerParams(
                dimension_semantics=("parallel",),
                vmem_limit_bytes=vmem_limit_bytes,
            ),
            cost_estimate=cost,
        )(x2d, w_gu, w_down)
    else:
        out2d = pl.pallas_call(
            _mlp_kernel_tiled,
            out_shape=jax.ShapeDtypeStruct((Mp, H), out_dtype),
            grid_spec=pltpu.PrefetchScalarGridSpec(
                num_scalar_prefetch=0,
                grid=(n_m, n_k),
                in_specs=[
                    pl.BlockSpec((tm, H), lambda i, k: (i, 0)),       # x rows
                    pl.BlockSpec((2 * ti, H), lambda i, k: (k, 0)),   # gate+up tile
                    pl.BlockSpec((H, ti), lambda i, k: (0, k)),       # down tile
                ],
                out_specs=pl.BlockSpec((tm, H), lambda i, k: (i, 0)),
                scratch_shapes=[pltpu.VMEM((tm, H), jnp.float32)],
            ),
            compiler_params=pltpu.CompilerParams(
                dimension_semantics=("parallel", "arbitrary"),
                vmem_limit_bytes=vmem_limit_bytes,
            ),
            cost_estimate=cost,
        )(x2d, w_gu, w_down)

    return out2d[:M].reshape(B, S, H)


# ----------------------------------------------------------------------------
# Reference + test
# ----------------------------------------------------------------------------
def _reference(x, w_gate, w_up, w_down):
    g = x @ w_gate.T
    u = x @ w_up.T
    return (jax.nn.silu(g) * u) @ w_down.T


if __name__ == "__main__":
    # Small shapes consistent with VishwamaiConfig: (batch, seq, hidden)
    batch, seq = 2, 8
    hidden, intermediate = 256, 512

    key = jax.random.PRNGKey(0)
    kx, kg, ku, kd = jax.random.split(key, 4)

    x = jax.random.normal(kx, (batch, seq, hidden), dtype=jnp.float32)
    # nn.Linear(hidden, intermediate, bias=False).weight -> (intermediate, hidden)
    w_gate = jax.random.normal(kg, (intermediate, hidden), jnp.float32) * 0.02
    w_up = jax.random.normal(ku, (intermediate, hidden), jnp.float32) * 0.02
    # nn.Linear(intermediate, hidden, bias=False).weight -> (hidden, intermediate)
    w_down = jax.random.normal(kd, (hidden, intermediate), jnp.float32) * 0.02

    out = vishwamai_mlp(x, w_gate, w_up, w_down)
    out = jax.block_until_ready(out)

    ref = _reference(x, w_gate, w_up, w_down)
    assert out.shape == (batch, seq, hidden)
    assert jnp.allclose(out, ref, atol=1e-3, rtol=1e-3), \
        float(jnp.max(jnp.abs(out - ref)))

    print("KERNEL_OK")
</pallas_src>

<mosaic_0001>
module attributes {stable_mosaic.version = 11 : i64} {
  func.func @_mlp_kernel_resident(%arg0: i32, %arg1: memref<16x256xf32, #tpu.memory_space<vmem>>, %arg2: memref<1024x256xf32, #tpu.memory_space<vmem>>, %arg3: memref<256x512xf32, #tpu.memory_space<vmem>>, %arg4: memref<16x256xf32, #tpu.memory_space<vmem>>) attributes {dimension_semantics = [#tpu.dimension_semantics<parallel>], iteration_bounds = array<i64: 1>, scalar_prefetch = 0 : i64, scratch_operands = 0 : i64, tpu.core_type = #tpu.core_type<tc>, window_params = [{transform_indices = @transform_0, window_bounds = array<i64: 16, 256>}, {pipeline_mode = #tpu.pipeline_mode<synchronous>, transform_indices = @transform_1, window_bounds = array<i64: 1024, 256>}, {pipeline_mode = #tpu.pipeline_mode<synchronous>, transform_indices = @transform_2, window_bounds = array<i64: 256, 512>}, {transform_indices = @transform_3, window_bounds = array<i64: 16, 256>}]} {
    %c0 = arith.constant 0 : index
    %c0_0 = arith.constant 0 : index
    %0 = vector.load %arg1[%c0, %c0_0] : memref<16x256xf32, #tpu.memory_space<vmem>>, vector<16x256xf32>
    %c0_1 = arith.constant 0 : index
    %c0_2 = arith.constant 0 : index
    %1 = vector.load %arg2[%c0_1, %c0_2] : memref<1024x256xf32, #tpu.memory_space<vmem>>, vector<1024x256xf32>
    %c0_3 = arith.constant 0 : index
    %c0_4 = arith.constant 0 : index
    %2 = vector.load %arg3[%c0_3, %c0_4] : memref<256x512xf32, #tpu.memory_space<vmem>>, vector<256x512xf32>
    %cst = arith.constant dense<0.000000e+00> : vector<16x1024xf32>
    %3 = tpu.matmul %0, %1, %cst {dimension_numbers = #tpu.dot_dimension_numbers<[1], [1], [0], [0], [0, 0, 1, 0], [], []>} : vector<16x256xf32>, vector<1024x256xf32>, vector<16x1024xf32> -> vector<16x1024xf32>
    %4 = vector.extract_strided_slice %3 {offsets = [0, 0], sizes = [16, 512], strides = [1, 1]} : vector<16x1024xf32> to vector<16x512xf32>
    %5 = vector.extract_strided_slice %3 {offsets = [0, 512], sizes = [16, 512], strides = [1, 1]} : vector<16x1024xf32> to vector<16x512xf32>
    %6 = math.absf %4 : vector<16x512xf32>
    %cst_5 = arith.constant 0.000000e+00 : f32
    %7 = vector.broadcast %cst_5 : f32 to vector<16x512xf32>
    %8 = arith.subf %7, %6 : vector<16x512xf32>
    %9 = math.exp %8 : vector<16x512xf32>
    %cst_6 = arith.constant 1.000000e+00 : f32
    %10 = vector.broadcast %cst_6 : f32 to vector<16x512xf32>
    %11 = arith.addf %10, %9 : vector<16x512xf32>
    %cst_7 = arith.constant 1.000000e+00 : f32
    %12 = vector.broadcast %cst_7 : f32 to vector<16x512xf32>
    %13 = arith.divf %12, %11 : vector<16x512xf32>
    %cst_8 = arith.constant 0.000000e+00 : f32
    %14 = vector.broadcast %cst_8 : f32 to vector<16x512xf32>
    %15 = arith.cmpf oge, %4, %14 : vector<16x512xf32>
    %16 = arith.mulf %9, %13 : vector<16x512xf32>
    %17 = arith.select %15, %13, %16 : vector<16x512xi1>, vector<16x512xf32>
    %18 = arith.mulf %4, %17 : vector<16x512xf32>
    %19 = arith.mulf %18, %5 : vector<16x512xf32>
    %cst_9 = arith.constant dense<0.000000e+00> : vector<16x256xf32>
    %20 = tpu.matmul %19, %2, %cst_9 {dimension_numbers = #tpu.dot_dimension_numbers<[1], [1], [0], [0], [0, 0, 1, 0], [], []>} : vector<16x512xf32>, vector<256x512xf32>, vector<16x256xf32> -> vector<16x256xf32>
    %c0_10 = arith.constant 0 : index
    %c0_11 = arith.constant 0 : index
    %21 = vector.load %arg4[%c0_10, %c0_11] : memref<16x256xf32, #tpu.memory_space<vmem>>, vector<16x256xf32>
    tpu.vector_store %arg4[%c0_10, %c0_11], %20 {strides = array<i32>} : memref<16x256xf32, #tpu.memory_space<vmem>>, vector<16x256xf32>,
    return
  }
  func.func @transform_0(%arg0: i32) -> (i32, i32) {
    %c0_i32 = arith.constant 0 : i32
    %c0_i32_0 = arith.constant 0 : i32
    return %arg0, %c0_i32 : i32, i32
  }
  func.func @transform_1(%arg0: i32) -> (i32, i32) {
    %c0_i32 = arith.constant 0 : i32
    %c0_i32_0 = arith.constant 0 : i32
    %c0_i32_1 = arith.constant 0 : i32
    return %c0_i32, %c0_i32_0 : i32, i32
  }
  func.func @transform_2(%arg0: i32) -> (i32, i32) {
    %c0_i32 = arith.constant 0 : i32
    %c0_i32_0 = arith.constant 0 : i32
    %c0_i32_1 = arith.constant 0 : i32
    return %c0_i32, %c0_i32_0 : i32, i32
  }
  func.func @transform_3(%arg0: i32) -> (i32, i32) {
    %c0_i32 = arith.constant 0 : i32
    %c0_i32_0 = arith.constant 0 : i32
    return %arg0, %c0_i32 : i32, i32
  }
}

</mosaic_0001>

<bundles_post_ra>
// kernel: tpu_custom_call.1
= control target key start
LH: loop header
LB: loop body
LE: loop exit
PB: predicated region body
PF: predicated region fallthrough
CT: control target
= control target key end

     0   :  { %8 = vsyncpa [#allocation3], 0  ;;  %s1714_s0 = inlined_call_operand.hbm [shape: f32[16,256], index: 0, kind: input, shape index: {}]   ;;  %s1715_s1 = inlined_call_operand.hbm [shape: f32[1024,256], index: 1, kind: input, shape index: {}]   ;;  %s1716_s2 = inlined_call_operand.hbm [shape: f32[256,512], index: 2, kind: input, shape index: {}]   ;;  %s1717_s3 = inlined_call_operand.hbm [shape: f32[16,256], index: 3, kind: output, shape index: {}]  }
   0x1   :  { %9 = vsyncpa [#allocation6], 0 }
   0x2   :  { %10 = vsyncpa [#allocation4], 0  ;;  %s1546_s12 = smov [#allocation5]   ;;  %s1547_s14 = smov [#allocation2]  }
   0x3   :  { %s28_s13 = sshll.u32 %s1546_s12, 4  ;;  %s16_s15 = sshll.u32 %s1547_s14, 4  ;;  %s29_s13 = int_to_ptr.vmem [resolvable:$true] %s28_s13  ;;  %s1574_s15 = int_to_ptr.vmem [resolvable:$true] %s16_s15 }
   0x4   :  { %s1452_s18 = scalar_lea.hbm %s1715_s1, 32768 }
   0x5   :  { %p1453_p0 = scmp.ne.s32.totalorder %s1715_s1, %s1452_s18  ;;  %p1456_p1 = scmp.lt.u32.totalorder %s1452_s18, %s1715_s1 }
   0x7   :  { %p1458_p2 = pnand %p1456_p1, %p1453_p0 }
   0x9   :  { %1461 = shalt.err (!%p1458_p2)
}
   0xa   :  { %s1462_s23 = scalar_lea.vmem %s29_s13, 32768  ;;  %p1467_p4 = scmp.lt.s32.totalorder %s29_s13, %s29_s13 }
   0xb   :  { %p1463_p3 = scmp.ne.s32.totalorder %s29_s13, %s1462_s23  ;;  %p1468_p5 = scmp.lt.s32.totalorder %s1462_s23, %s1462_s23 }
   0xd   :  { %p1469_p6 = por %p1468_p5, %p1467_p4 }
   0xf   :  { %p1470_p7 = pnand %p1469_p6, %p1463_p3 }
  0x11   :  { %1473 = shalt.err (!%p1470_p7)
}
  0x12   :  { %s1548_s24 = smov 256   ;;  %s1549_s25 = smov 16  }
  0x13   :  { %34 = dma.hbm_to_vmem [thread:$0]  %s1715_s1, 32768, %s29_s13, [#allocation6], %s1548_s24, %s1548_s24, %s1549_s25  }
  0x14   :  { %s1474_s30 = scalar_lea.hbm %s1714_s0, 512 }
  0x15   :  { %p1475_p8 = scmp.ne.s32.totalorder %s1714_s0, %s1474_s30  ;;  %p1478_p9 = scmp.lt.u32.totalorder %s1474_s30, %s1714_s0 }
  0x17   :  { %p1480_p10 = pnand %p1478_p9, %p1475_p8 }
  0x19   :  { %1483 = shalt.err (!%p1480_p10)
}
  0x1a   :  { %s1484_s8 = scalar_lea.vmem %s1574_s15, 512  ;;  %p1489_p12 = scmp.lt.s32.totalorder %s1574_s15, %s1574_s15 }
  0x1b   :  { %p1485_p11 = scmp.ne.s32.totalorder %s1574_s15, %s1484_s8  ;;  %p1490_p13 = scmp.lt.s32.totalorder %s1484_s8, %s1484_s8 }
  0x1d   :  { %p1491_p0 = por %p1490_p13, %p1489_p12 }
  0x1f   :  { %p1492_p1 = pnand %p1491_p0, %p1485_p11 }
  0x21   :  { %1495 = shalt.err (!%p1492_p1)
}
  0x22   :  { %22 = dma.hbm_to_vmem [thread:$0]  %s1714_s0, 512, %s1574_s15, [#allocation3], %s1548_s24, %s1548_s24, %s1549_s25  }
  0x23   :  { %s1550_s10 = smov [#allocation7]   ;;  %s1496_s14 = scalar_lea.hbm %s1716_s2, 16384 }
  0x24   :  { %s40_s11 = sshll.u32 %s1550_s10, 4  ;;  %p1497_p2 = scmp.ne.s32.totalorder %s1716_s2, %s1496_s14  ;;  %s41_s11 = int_to_ptr.vmem [resolvable:$true] %s40_s11 }
  0x25   :  { %p1500_p3 = scmp.lt.u32.totalorder %s1496_s14, %s1716_s2 }
  0x27   :  { %p1502_p4 = pnand %p1500_p3, %p1497_p2 }
  0x29   :  { %1505 = shalt.err (!%p1502_p4)
}
  0x2a   :  { %s1506_s20 = scalar_lea.vmem %s41_s11, 16384  ;;  %p1511_p6 = scmp.lt.s32.totalorder %s41_s11, %s41_s11 }
  0x2b   :  { %p1507_p5 = scmp.ne.s32.totalorder %s41_s11, %s1506_s20  ;;  %p1512_p7 = scmp.lt.s32.totalorder %s1506_s20, %s1506_s20 }
  0x2d   :  { %p1513_p8 = por %p1512_p7, %p1511_p6 }
  0x2f   :  { %p1514_p9 = pnand %p1513_p8, %p1507_p5 }
  0x31   :  { %1517 = shalt.err (!%p1514_p9)
}
  0x32   :  { %s1551_s0 = smov 512   ;;  %s1552_s15 = smov 32  }
  0x33   :  { %46 = dma.hbm_to_vmem [thread:$0]  %s1716_s2, 16384, %s41_s11, [#allocation6], %s1551_s0, %s1551_s0, %s1552_s15  }
  0x34   :  { %1540 = dma.done.wait [#allocation3], 512  }
  0x35   :  { %1541 = vsyncadd [#allocation3], 4294966784 }
  0x36   :  { %1542 = dma.done.wait [#allocation6], 49152  }
  0x37   :  { %1543 = vsyncadd [#allocation6], 4294918144  ;;  %v61_v0 = vld [vmem:[#allocation5 + $0x8] sm:$0xff]  ;;  %v63_v1 = vld [vmem:[#allocation5 + $0x18] sm:$0xff]  ;;  %s1553_s2 = smov [#allocation8]  }
  0x38   :  { %v60_v2 = vld [vmem:[#allocation5] sm:$0xff]  ;;  %v1024_v3 = vpack.c.bf16 %v63_v1, %v61_v0  ;;  %v62_v4 = vld [vmem:[#allocation5 + $0x10] sm:$0xff]  ;;  %v65_v5 = vld [vmem:[#allocation5 + $0x28] sm:$0xff]  ;;  %s1011_s23 = sshll.u32 %s1553_s2, 4  ;;  %s1012_s23 = int_to_ptr.vmem [resolvable:$true] %s1011_s23 }
  0x39   :  { %v67_v6 = vld [vmem:[#allocation5 + $0x38] sm:$0xff]  ;;  %v1026_v7 = vpack.c.bf16 %v62_v4, %v60_v2  ;;  %v64_v9 = vld [vmem:[#allocation5 + $0x20] sm:$0xff]  ;;  %v66_v10 = vld [vmem:[#allocation5 + $0x30] sm:$0xff]  ;;  %s1518_s26 = scalar_lea.vmem %s1012_s23, 512  ;;  %p1523_p11 = scmp.lt.s32.totalorder %s1012_s23, %s1012_s23 }
  0x3a   :  { %v1028_v8 = vpack.c.bf16 %v67_v6, %v65_v5  ;;  %1025 = vmatprep.subr.bf16.mxu1 %v1024_v3  ;;  %v69_v11 = vld [vmem:[#allocation5 + $0x48] sm:$0xff]  ;;  %v71_v12 = vld [vmem:[#allocation5 + $0x58] sm:$0xff]  ;;  %v188_v15 = vld [vmem:[#allocation5 + $0x400] sm:$0xff]  ;;  %v1030_v17 = vpack.c.bf16 %v66_v10, %v64_v9  ;;  %p1519_p10 = scmp.ne.s32.totalorder %s1012_s23, %s1518_s26  ;;  %p1524_p12 = scmp.lt.s32.totalorder %s1518_s26, %s1518_s26 }
  0x3b   :  { %1027 = vmatpush1.bf16.xpose.msra.mxu1 %v1026_v7  ;;  %v189_v13 = vld [vmem:[#allocation5 + $0x408] sm:$0xff]  ;;  %v191_v14 = vld [vmem:[#allocation5 + $0x418] sm:$0xff]  ;;  %v190_v16 = vld [vmem:[#allocation5 + $0x410] sm:$0xff]  ;;  %v1032_v20 = vpack.c.bf16 %v71_v12, %v69_v11 }
  0x3c   :  { %1029 = vmatprep.subr.bf16.mxu1 %v1028_v8  ;;  %v1152_v18 = vpack.c.bf16 %v191_v14, %v189_v13  ;;  %v1154_v19 = vpack.c.bf16 %v190_v16, %v188_v15  ;;  %v193_v21 = vld [vmem:[#allocation5 + $0x428] sm:$0xff]  ;;  %v195_v22 = vld [vmem:[#allocation5 + $0x438] sm:$0xff]  ;;  %v68_v24 = vld [vmem:[#allocation5 + $0x40] sm:$0xff]  ;;  %p1525_p13 = por %p1524_p12, %p1523_p11 }
  0x3d   :  { %v1156_v23 = vpack.c.bf16 %v195_v22, %v193_v21  ;;  %v192_v25 = vld [vmem:[#allocation5 + $0x420] sm:$0xff]  ;;  %v194_v26 = vld [vmem:[#allocation5 + $0x430] sm:$0xff]  ;;  %v197_v28 = vld [vmem:[#allocation5 + $0x448] sm:$0xff] }
  0x3e   :  { %1153 = vmatprep.subr.bf16.mxu0 %v1152_v18  ;;  %v70_v27 = vld [vmem:[#allocation5 + $0x50] sm:$0xff]  ;;  %v199_v29 = vld [vmem:[#allocation5 + $0x458] sm:$0xff]  ;;  %v73_v30 = vld [vmem:[#allocation5 + $0x68] sm:$0xff]  ;;  %v1158_v32 = vpack.c.bf16 %v194_v26, %v192_v25  ;;  %p1526_p0 = pnand %p1525_p13, %p1519_p10 }
  0x3f   :  { %1155 = vmatpush1.bf16.xpose.msra.mxu0 %v1154_v19  ;;  %v75_v31 = vld [vmem:[#allocation5 + $0x78] sm:$0xff]  ;;  %v1034_v33 = vpack.c.bf16 %v70_v27, %v68_v24  ;;  %v1160_v34 = vpack.c.bf16 %v199_v29, %v197_v28  ;;  %v72_v36 = vld [vmem:[#allocation5 + $0x60] sm:$0xff]  ;;  %v198_v38 = vld [vmem:[#allocation5 + $0x450] sm:$0xff] }
  0x40   :  { %1157 = vmatprep.subr.bf16.mxu0 %v1156_v23  ;;  %v1036_v35 = vpack.c.bf16 %v75_v31, %v73_v30  ;;  %v196_v37 = vld [vmem:[#allocation5 + $0x440] sm:$0xff]  ;;  %v74_v39 = vld [vmem:[#allocation5 + $0x70] sm:$0xff]  ;;  %v201_v40 = vld [vmem:[#allocation5 + $0x468] sm:$0xff] }
  0x41   :  { %v203_v41 = vld [vmem:[#allocation5 + $0x478] sm:$0xff]  ;;  %v77_v42 = vld [vmem:[#allocation5 + $0x88] sm:$0xff]  ;;  %v1162_v44 = vpack.c.bf16 %v198_v38, %v196_v37  ;;  %v1038_v45 = vpack.c.bf16 %v74_v39, %v72_v36  ;;  %v76_v48 = vld [vmem:[#allocation5 + $0x80] sm:$0xff] }
  0x42   :  { %v79_v43 = vld [vmem:[#allocation5 + $0x98] sm:$0xff]  ;;  %v1164_v46 = vpack.c.bf16 %v203_v41, %v201_v40  ;;  %v200_v49 = vld [vmem:[#allocation5 + $0x460] sm:$0xff]  ;;  %v202_v50 = vld [vmem:[#allocation5 + $0x470] sm:$0xff] }
  0x43   :  { %1031 = vmatpush1.bf16.xpose.msra.mxu1 %v1030_v17  ;;  %v1040_v47 = vpack.c.bf16 %v79_v43, %v77_v42  ;;  %v78_v51 = vld [vmem:[#allocation5 + $0x90] sm:$0xff]  ;;  %v205_v52 = vld [vmem:[#allocation5 + $0x488] sm:$0xff]  ;;  %v207_v53 = vld [vmem:[#allocation5 + $0x498] sm:$0xff]  ;;  %v1166_v56 = vpack.c.bf16 %v202_v50, %v200_v49 }
  0x44   :  { %1033 = vmatprep.subr.bf16.mxu1 %v1032_v20  ;;  %v81_v54 = vld [vmem:[#allocation5 + $0xa8] sm:$0xff]  ;;  %v83_v55 = vld [vmem:[#allocation5 + $0xb8] sm:$0xff]  ;;  %v1042_v57 = vpack.c.bf16 %v78_v51, %v76_v48  ;;  %v1168_v58 = vpack.c.bf16 %v207_v53, %v205_v52  ;;  %v80_v60 = vld [vmem:[#allocation5 + $0xa0] sm:$0xff] }
  0x45   :  { %v1044_v59 = vpack.c.bf16 %v83_v55, %v81_v54  ;;  %v82_v61 = vld [vmem:[#allocation5 + $0xb0] sm:$0xff]  ;;  %v204_v62 = vld [vmem:[#allocation5 + $0x480] sm:$0xff]  ;;  %v209_v0 = vld [vmem:[#allocation5 + $0x4a8] sm:$0xff] }
  0x46   :  { %v206_v63 = vld [vmem:[#allocation5 + $0x490] sm:$0xff]  ;;  %v211_v1 = vld [vmem:[#allocation5 + $0x4b8] sm:$0xff]  ;;  %v1623_v2 = vld [vmem:[#allocation2 + $0x8] sm:$0xff]  ;;  %v1046_v6 = vpack.c.bf16 %v82_v61, %v80_v60 }
  0x47   :  { %1159 = vmatpush1.bf16.xpose.msra.mxu0 %v1158_v32  ;;  %v85_v3 = vld [vmem:[#allocation5 + $0xc8] sm:$0xff]  ;;  %v87_v4 = vld [vmem:[#allocation5 + $0xd8] sm:$0xff]  ;;  %508 = vmatprep.mubr.f32.mxu1 %v1623_v2  ;;  %v1170_v5 = vpack.c.bf16 %v206_v63, %v204_v62  ;;  %v1172_v7 = vpack.c.bf16 %v211_v1, %v209_v0  ;;  %v84_v9 = vld [vmem:[#allocation5 + $0xc0] sm:$0xff] }
  0x48   :  { %1161 = vmatprep.subr.bf16.mxu0 %v1160_v34  ;;  %662 = vmatprep.mubr.f32.mxu0 %v1623_v2  ;;  %v1048_v8 = vpack.c.bf16 %v87_v4, %v85_v3  ;;  %v208_v10 = vld [vmem:[#allocation5 + $0x4a0] sm:$0xff]  ;;  %v210_v11 = vld [vmem:[#allocation5 + $0x4b0] sm:$0xff]  ;;  %v213_v13 = vld [vmem:[#allocation5 + $0x4c8] sm:$0xff] }
  0x49   :  { %v86_v12 = vld [vmem:[#allocation5 + $0xd0] sm:$0xff]  ;;  %v215_v14 = vld [vmem:[#allocation5 + $0x4d8] sm:$0xff]  ;;  %v89_v15 = vld [vmem:[#allocation5 + $0xe8] sm:$0xff]  ;;  %v1174_v17 = vpack.c.bf16 %v210_v11, %v208_v10 }
  0x4a   :  { %v91_v16 = vld [vmem:[#allocation5 + $0xf8] sm:$0xff]  ;;  %v1050_v18 = vpack.c.bf16 %v86_v12, %v84_v9  ;;  %v1176_v19 = vpack.c.bf16 %v215_v14, %v213_v13  ;;  %v88_v21 = vld [vmem:[#allocation5 + $0xe0] sm:$0xff]  ;;  %v214_v23 = vld [vmem:[#allocation5 + $0x4d0] sm:$0xff] }
  0x4b   :  { %1035 = vmatpush1.bf16.xpose.msra.mxu1 %v1034_v33  ;;  %v1052_v20 = vpack.c.bf16 %v91_v16, %v89_v15  ;;  %v212_v22 = vld [vmem:[#allocation5 + $0x4c0] sm:$0xff]  ;;  %v90_v24 = vld [vmem:[#allocation5 + $0xf0] sm:$0xff]  ;;  %v217_v25 = vld [vmem:[#allocation5 + $0x4e8] sm:$0xff] }
  0x4c   :  { %1037 = vmatprep.subr.bf16.mxu1 %v1036_v35  ;;  %v219_v26 = vld [vmem:[#allocation5 + $0x4f8] sm:$0xff]  ;;  %v93_v27 = vld [vmem:[#allocation5 + $0x108] sm:$0xff]  ;;  %v1178_v29 = vpack.c.bf16 %v214_v23, %v212_v22  ;;  %v1054_v30 = vpack.c.bf16 %v90_v24, %v88_v21  ;;  %v92_v33 = vld [vmem:[#allocation5 + $0x100] sm:$0xff] }
  0x4d   :  { %v95_v28 = vld [vmem:[#allocation5 + $0x118] sm:$0xff]  ;;  %v1180_v31 = vpack.c.bf16 %v219_v26, %v217_v25  ;;  %v216_v34 = vld [vmem:[#allocation5 + $0x4e0] sm:$0xff]  ;;  %v218_v35 = vld [vmem:[#allocation5 + $0x4f0] sm:$0xff] }
  0x4e   :  { %v1056_v32 = vpack.c.bf16 %v95_v28, %v93_v27  ;;  %v94_v36 = vld [vmem:[#allocation5 + $0x110] sm:$0xff]  ;;  %v221_v37 = vld [vmem:[#allocation5 + $0x508] sm:$0xff]  ;;  %v223_v38 = vld [vmem:[#allocation5 + $0x518] sm:$0xff]  ;;  %v1182_v41 = vpack.c.bf16 %v218_v35, %v216_v34 }
  0x4f   :  { %1163 = vmatpush1.bf16.xpose.msra.mxu0 %v1162_v44  ;;  %v97_v39 = vld [vmem:[#allocation5 + $0x128] sm:$0xff]  ;;  %v99_v40 = vld [vmem:[#allocation5 + $0x138] sm:$0xff]  ;;  %v1058_v42 = vpack.c.bf16 %v94_v36, %v92_v33  ;;  %v1184_v43 = vpack.c.bf16 %v223_v38, %v221_v37  ;;  %v98_v48 = vld [vmem:[#allocation5 + $0x130] sm:$0xff] }
  0x50   :  { %1165 = vmatprep.subr.bf16.mxu0 %v1164_v46  ;;  %v1060_v44 = vpack.c.bf16 %v99_v40, %v97_v39  ;;  %v220_v46 = vld [vmem:[#allocation5 + $0x500] sm:$0xff]  ;;  %v225_v49 = vld [vmem:[#allocation5 + $0x528] sm:$0xff]  ;;  %v227_v50 = vld [vmem:[#allocation5 + $0x538] sm:$0xff] }
  0x51   :  { %v101_v51 = vld [vmem:[#allocation5 + $0x148] sm:$0xff]  ;;  %v103_v52 = vld [vmem:[#allocation5 + $0x158] sm:$0xff]  ;;  %v1188_v55 = vpack.c.bf16 %v227_v50, %v225_v49  ;;  %v102_v60 = vld [vmem:[#allocation5 + $0x150] sm:$0xff] }
  0x52   :  { %v229_v61 = vld [vmem:[#allocation5 + $0x548] sm:$0xff]  ;;  %v231_v62 = vld [vmem:[#allocation5 + $0x558] sm:$0xff]  ;;  %v106_v9 = vld [vmem:[#allocation5 + $0x170] sm:$0xff] }
  0x53   :  { %1039 = vmatpush1.bf16.xpose.msra.mxu1 %v1038_v45  ;;  %v96_v45 = vld [vmem:[#allocation5 + $0x120] sm:$0xff]  ;;  %v105_v63 = vld [vmem:[#allocation5 + $0x168] sm:$0xff]  ;;  %v107_v0 = vld [vmem:[#allocation5 + $0x178] sm:$0xff]  ;;  %v1192_v4 = vpack.c.bf16 %v231_v62, %v229_v61 }
  0x54   :  { %1041 = vmatprep.subr.bf16.mxu1 %v1040_v47  ;;  %v222_v47 = vld [vmem:[#allocation5 + $0x510] sm:$0xff]  ;;  %v1062_v54 = vpack.c.bf16 %v98_v48, %v96_v45  ;;  %v233_v10 = vld [vmem:[#allocation5 + $0x568] sm:$0xff]  ;;  %v235_v11 = vld [vmem:[#allocation5 + $0x578] sm:$0xff] }
  0x55   :  { %v1186_v53 = vpack.c.bf16 %v222_v47, %v220_v46  ;;  %v109_v12 = vld [vmem:[#allocation5 + $0x188] sm:$0xff]  ;;  %v111_v13 = vld [vmem:[#allocation5 + $0x198] sm:$0xff]  ;;  %v1196_v16 = vpack.c.bf16 %v235_v11, %v233_v10  ;;  %v110_v21 = vld [vmem:[#allocation5 + $0x190] sm:$0xff] }
  0x56   :  { %v237_v22 = vld [vmem:[#allocation5 + $0x588] sm:$0xff]  ;;  %v239_v23 = vld [vmem:[#allocation5 + $0x598] sm:$0xff]  ;;  %v114_v33 = vld [vmem:[#allocation5 + $0x1b0] sm:$0xff] }
  0x57   :  { %1167 = vmatpush1.bf16.xpose.msra.mxu0 %v1166_v56  ;;  %v1064_v56 = vpack.c.bf16 %v103_v52, %v101_v51  ;;  %v113_v24 = vld [vmem:[#allocation5 + $0x1a8] sm:$0xff]  ;;  %v115_v25 = vld [vmem:[#allocation5 + $0x1b8] sm:$0xff]  ;;  %v1200_v28 = vpack.c.bf16 %v239_v23, %v237_v22  ;;  %v118_v45 = vld [vmem:[#allocation5 + $0x1d0] sm:$0xff] }
  0x58   :  { %1169 = vmatprep.subr.bf16.mxu0 %v1168_v58  ;;  %v224_v58 = vld [vmem:[#allocation5 + $0x520] sm:$0xff]  ;;  %v241_v34 = vld [vmem:[#allocation5 + $0x5a8] sm:$0xff]  ;;  %v243_v35 = vld [vmem:[#allocation5 + $0x5b8] sm:$0xff] }
  0x59   :  { %v117_v36 = vld [vmem:[#allocation5 + $0x1c8] sm:$0xff]  ;;  %v119_v37 = vld [vmem:[#allocation5 + $0x1d8] sm:$0xff]  ;;  %v1204_v40 = vpack.c.bf16 %v243_v35, %v241_v34 }
  0x5a   :  { %v245_v46 = vld [vmem:[#allocation5 + $0x5c8] sm:$0xff]  ;;  %v247_v47 = vld [vmem:[#allocation5 + $0x5d8] sm:$0xff] }
  0x5b   :  { %1043 = vmatpush1.bf16.xpose.msra.mxu1 %v1042_v57  ;;  %v100_v57 = vld [vmem:[#allocation5 + $0x140] sm:$0xff]  ;;  %v121_v48 = vld [vmem:[#allocation5 + $0x1e8] sm:$0xff]  ;;  %v123_v49 = vld [vmem:[#allocation5 + $0x1f8] sm:$0xff]  ;;  %v1208_v52 = vpack.c.bf16 %v247_v47, %v245_v46 }
  0x5c   :  { %1045 = vmatprep.subr.bf16.mxu1 %v1044_v59  ;;  %v226_v59 = vld [vmem:[#allocation5 + $0x530] sm:$0xff]  ;;  %v1066_v3 = vpack.c.bf16 %v102_v60, %v100_v57  ;;  %v125_v60 = vld [vmem:[#allocation5 + $0x208] sm:$0xff]  ;;  %v127_v61 = vld [vmem:[#allocation5 + $0x218] sm:$0xff] }
  0x5d   :  { %v1190_v1 = vpack.c.bf16 %v226_v59, %v224_v58  ;;  %v122_v57 = vld [vmem:[#allocation5 + $0x1f0] sm:$0xff]  ;;  %v249_v58 = vld [vmem:[#allocation5 + $0x5e8] sm:$0xff]  ;;  %v251_v59 = vld [vmem:[#allocation5 + $0x5f8] sm:$0xff] }
  0x5e   :  { %v321_v10 = vld [vmem:[#allocation7 + $0x28] sm:$0xff] }
  0x5f   :  { %1171 = vmatpush1.bf16.xpose.msra.mxu0 %v1170_v5  ;;  %v1068_v5 = vpack.c.bf16 %v107_v0, %v105_v63  ;;  %v1212_v0 = vpack.c.bf16 %v251_v59, %v249_v58  ;;  %v325_v22 = vld [vmem:[#allocation7 + $0x48] sm:$0xff] }
  0x60   :  { %1173 = vmatprep.subr.bf16.mxu0 %v1172_v7  ;;  %v228_v7 = vld [vmem:[#allocation5 + $0x540] sm:$0xff]  ;;  %v329_v23 = vld [vmem:[#allocation7 + $0x68] sm:$0xff] }
  0x61   :  { %v333_v34 = vld [vmem:[#allocation7 + $0x88] sm:$0xff] }
  0x62   :  { %v337_v35 = vld [vmem:[#allocation7 + $0xa8] sm:$0xff] }
  0x63   :  { %1047 = vmatpush1.bf16.xpose.msra.mxu1 %v1046_v6  ;;  %v104_v6 = vld [vmem:[#allocation5 + $0x160] sm:$0xff]  ;;  %v341_v46 = vld [vmem:[#allocation7 + $0xc8] sm:$0xff] }
  0x64   :  { %1049 = vmatprep.subr.bf16.mxu1 %v1048_v8  ;;  %v230_v8 = vld [vmem:[#allocation5 + $0x550] sm:$0xff]  ;;  %v1070_v15 = vpack.c.bf16 %v106_v9, %v104_v6  ;;  %v317_v9 = vld [vmem:[#allocation7 + $0x8] sm:$0xff] }
  0x65   :  { %v1194_v14 = vpack.c.bf16 %v230_v8, %v228_v7  ;;  %v126_v6 = vld [vmem:[#allocation5 + $0x210] sm:$0xff]  ;;  %v129_v7 = vld [vmem:[#allocation5 + $0x228] sm:$0xff]  ;;  %v131_v8 = vld [vmem:[#allocation5 + $0x238] sm:$0xff] }
  0x66   :  { %v345_v47 = vld [vmem:[#allocation7 + $0xe8] sm:$0xff] }
  0x67   :  { %1175 = vmatpush1.bf16.xpose.msra.mxu0 %v1174_v17  ;;  %v1072_v17 = vpack.c.bf16 %v111_v13, %v109_v12  ;;  %v1627_v12 = vld [vmem:[#allocation2] sm:$0xff]  ;;  %v349_v58 = vld [vmem:[#allocation7 + $0x108] sm:$0xff] }
  0x68   :  { %1177 = vmatprep.subr.bf16.mxu0 %v1176_v19  ;;  %v232_v19 = vld [vmem:[#allocation5 + $0x560] sm:$0xff]  ;;  %v353_v59 = vld [vmem:[#allocation7 + $0x128] sm:$0xff] }
  0x6b   :  { %1051 = vmatpush1.bf16.xpose.msra.mxu1 %v1050_v18  ;;  %v108_v18 = vld [vmem:[#allocation5 + $0x180] sm:$0xff] }
  0x6c   :  { %1053 = vmatprep.subr.bf16.mxu1 %v1052_v20  ;;  %v234_v20 = vld [vmem:[#allocation5 + $0x570] sm:$0xff]  ;;  %v1074_v27 = vpack.c.bf16 %v110_v21, %v108_v18 }
  0x6d   :  { %v1198_v26 = vpack.c.bf16 %v234_v20, %v232_v19  ;;  %v1633_v18 = vld [vmem:[#allocation2 + $0x10] sm:$0xff]  ;;  %v316_v19 = vld [vmem:[#allocation7] sm:$0xff] }
  0x6e   :  { %v320_v20 = vld [vmem:[#allocation7 + $0x20] sm:$0xff]  ;;  %v130_v21 = vld [vmem:[#allocation5 + $0x230] sm:$0xff] }
  0x6f   :  { %1179 = vmatpush1.bf16.xpose.msra.mxu0 %v1178_v29  ;;  %v1076_v29 = vpack.c.bf16 %v115_v25, %v113_v24  ;;  %v133_v24 = vld [vmem:[#allocation5 + $0x248] sm:$0xff]  ;;  %v135_v25 = vld [vmem:[#allocation5 + $0x258] sm:$0xff] }
  0x70   :  { %1181 = vmatprep.subr.bf16.mxu0 %v1180_v31  ;;  %v236_v31 = vld [vmem:[#allocation5 + $0x580] sm:$0xff] }
  0x73   :  { %1055 = vmatpush1.bf16.xpose.msra.mxu1 %v1054_v30  ;;  %v112_v30 = vld [vmem:[#allocation5 + $0x1a0] sm:$0xff] }
  0x74   :  { %1057 = vmatprep.subr.bf16.mxu1 %v1056_v32  ;;  %v238_v32 = vld [vmem:[#allocation5 + $0x590] sm:$0xff]  ;;  %v1078_v39 = vpack.c.bf16 %v114_v33, %v112_v30  ;;  %v132_v30 = vld [vmem:[#allocation5 + $0x240] sm:$0xff] }
  0x75   :  { %v1202_v38 = vpack.c.bf16 %v238_v32, %v236_v31  ;;  %v324_v31 = vld [vmem:[#allocation7 + $0x40] sm:$0xff]  ;;  %v134_v33 = vld [vmem:[#allocation5 + $0x250] sm:$0xff] }
  0x76   :  { %v328_v32 = vld [vmem:[#allocation7 + $0x60] sm:$0xff] }
  0x77   :  { %1183 = vmatpush1.bf16.xpose.msra.mxu0 %v1182_v41  ;;  %v1080_v41 = vpack.c.bf16 %v119_v37, %v117_v36  ;;  %v137_v36 = vld [vmem:[#allocation5 + $0x268] sm:$0xff]  ;;  %v139_v37 = vld [vmem:[#allocation5 + $0x278] sm:$0xff] }
  0x78   :  { %1185 = vmatprep.subr.bf16.mxu0 %v1184_v43  ;;  %v240_v43 = vld [vmem:[#allocation5 + $0x5a0] sm:$0xff] }
  0x7b   :  { %1059 = vmatpush1.bf16.xpose.msra.mxu1 %v1058_v42  ;;  %v116_v42 = vld [vmem:[#allocation5 + $0x1c0] sm:$0xff] }
  0x7c   :  { %1061 = vmatprep.subr.bf16.mxu1 %v1060_v44  ;;  %v242_v44 = vld [vmem:[#allocation5 + $0x5b0] sm:$0xff]  ;;  %v1082_v51 = vpack.c.bf16 %v118_v45, %v116_v42  ;;  %v136_v42 = vld [vmem:[#allocation5 + $0x260] sm:$0xff] }
  0x7d   :  { %v1206_v50 = vpack.c.bf16 %v242_v44, %v240_v43  ;;  %v332_v43 = vld [vmem:[#allocation7 + $0x80] sm:$0xff]  ;;  %v138_v45 = vld [vmem:[#allocation5 + $0x270] sm:$0xff] }
  0x7e   :  { %v336_v44 = vld [vmem:[#allocation7 + $0xa0] sm:$0xff] }
  0x7f   :  { %1187 = vmatpush1.bf16.xpose.msra.mxu0 %v1186_v53  ;;  %v1084_v53 = vpack.c.bf16 %v123_v49, %v121_v48  ;;  %v141_v48 = vld [vmem:[#allocation5 + $0x288] sm:$0xff]  ;;  %v143_v49 = vld [vmem:[#allocation5 + $0x298] sm:$0xff] }
  0x80   :  { %1189 = vmatprep.subr.bf16.mxu0 %v1188_v55  ;;  %v244_v55 = vld [vmem:[#allocation5 + $0x5c0] sm:$0xff] }
  0x83   :  { %1063 = vmatpush1.bf16.xpose.msra.mxu1 %v1062_v54  ;;  %v120_v54 = vld [vmem:[#allocation5 + $0x1e0] sm:$0xff] }
  0x84   :  { %1065 = vmatprep.subr.bf16.mxu1 %v1064_v56  ;;  %v246_v56 = vld [vmem:[#allocation5 + $0x5d0] sm:$0xff]  ;;  %v1086_v63 = vpack.c.bf16 %v122_v57, %v120_v54  ;;  %v140_v54 = vld [vmem:[#allocation5 + $0x280] sm:$0xff] }
  0x85   :  { %v1210_v62 = vpack.c.bf16 %v246_v56, %v244_v55  ;;  %v340_v55 = vld [vmem:[#allocation7 + $0xc0] sm:$0xff]  ;;  %v142_v57 = vld [vmem:[#allocation5 + $0x290] sm:$0xff] }
  0x86   :  { %v344_v56 = vld [vmem:[#allocation7 + $0xe0] sm:$0xff] }
  0x87   :  { %1191 = vmatpush1.bf16.xpose.msra.mxu0 %v1190_v1  ;;  %v1088_v1 = vpack.c.bf16 %v127_v61, %v125_v60  ;;  %v145_v60 = vld [vmem:[#allocation5 + $0x2a8] sm:$0xff]  ;;  %v147_v61 = vld [vmem:[#allocation5 + $0x2b8] sm:$0xff] }
  0x88   :  { %1193 = vmatprep.subr.bf16.mxu0 %v1192_v4  ;;  %v250_v4 = vld [vmem:[#allocation5 + $0x5f0] sm:$0xff] }
  0x8b   :  { %1067 = vmatpush1.bf16.xpose.msra.mxu1 %v1066_v3  ;;  %v248_v3 = vld [vmem:[#allocation5 + $0x5e0] sm:$0xff] }
  0x8c   :  { %1069 = vmatprep.subr.bf16.mxu1 %v1068_v5  ;;  %v124_v5 = vld [vmem:[#allocation5 + $0x200] sm:$0xff]  ;;  %v1214_v11 = vpack.c.bf16 %v250_v4, %v248_v3 }
  0x8d   :  { %v1090_v13 = vpack.c.bf16 %v126_v6, %v124_v5  ;;  %v144_v3 = vld [vmem:[#allocation5 + $0x2a0] sm:$0xff]  ;;  %v146_v6 = vld [vmem:[#allocation5 + $0x2b0] sm:$0xff] }
  0x8e   :  { %v348_v4 = vld [vmem:[#allocation7 + $0x100] sm:$0xff] }
  0x8f   :  { %1195 = vmatpush1.bf16.xpose.msra.mxu0 %v1194_v14  ;;  %v1092_v14 = vpack.c.bf16 %v131_v8, %v129_v7  ;;  %v352_v5 = vld [vmem:[#allocation7 + $0x120] sm:$0xff]  ;;  %v357_v7 = vld [vmem:[#allocation7 + $0x148] sm:$0xff] }
  0x90   :  { %1197 = vmatprep.subr.bf16.mxu0 %v1196_v16  ;;  %v1280_v16 = vpack.c.bf16 %v321_v10, %v317_v9  ;;  %v361_v8 = vld [vmem:[#allocation7 + $0x168] sm:$0xff]  ;;  %v151_v10 = vld [vmem:[#allocation5 + $0x2d8] sm:$0xff] }
  0x91   :  { %v149_v9 = vld [vmem:[#allocation5 + $0x2c8] sm:$0xff] }
  0x93   :  { %1071 = vmatpush1.bf16.xpose.msra.mxu1 %v1070_v15  ;;  %v1629_v15 = vld [vmem:[#allocation2 + $0x18] sm:$0xff] }
  0x94   :  { %1073 = vmatprep.subr.bf16.mxu1 %v1072_v17  ;;  %v128_v17 = vld [vmem:[#allocation5 + $0x220] sm:$0xff] }
  0x97   :  { %1199 = vmatpush1.bf16.xpose.msra.mxu0 %v1198_v26  ;;  %v1282_v26 = vpack.c.bf16 %v320_v20, %v316_v19  ;;  %v356_v19 = vld [vmem:[#allocation7 + $0x140] sm:$0xff] }
  0x98   :  { %1201 = vmatprep.subr.bf16.mxu0 %v1200_v28  ;;  %v1284_v28 = vpack.c.bf16 %v329_v23, %v325_v22  ;;  %v360_v20 = vld [vmem:[#allocation7 + $0x160] sm:$0xff]  ;;  %v365_v22 = vld [vmem:[#allocation7 + $0x188] sm:$0xff] }
  0x99   :  { %v369_v23 = vld [vmem:[#allocation7 + $0x1a8] sm:$0xff] }
  0x9b   :  { %1075 = vmatpush1.bf16.xpose.msra.mxu1 %v1074_v27  ;;  %v1094_v27 = vpack.c.bf16 %v130_v21, %v128_v17  ;;  %v148_v17 = vld [vmem:[#allocation5 + $0x2c0] sm:$0xff]  ;;  %v150_v21 = vld [vmem:[#allocation5 + $0x2d0] sm:$0xff] }
  0x9c   :  { %1077 = vmatprep.subr.bf16.mxu1 %v1076_v29  ;;  %v1096_v29 = vpack.c.bf16 %v135_v25, %v133_v24  ;;  %v153_v24 = vld [vmem:[#allocation5 + $0x2e8] sm:$0xff]  ;;  %v155_v25 = vld [vmem:[#allocation5 + $0x2f8] sm:$0xff] }
  0x9f   :  { %1203 = vmatpush1.bf16.xpose.msra.mxu0 %v1202_v38  ;;  %v1286_v38 = vpack.c.bf16 %v328_v32, %v324_v31  ;;  %v364_v31 = vld [vmem:[#allocation7 + $0x180] sm:$0xff] }
  0xa0   :  { %1205 = vmatprep.subr.bf16.mxu0 %v1204_v40  ;;  %v1288_v40 = vpack.c.bf16 %v337_v35, %v333_v34  ;;  %v368_v32 = vld [vmem:[#allocation7 + $0x1a0] sm:$0xff]  ;;  %v373_v34 = vld [vmem:[#allocation7 + $0x1c8] sm:$0xff] }
  0xa1   :  { %v377_v35 = vld [vmem:[#allocation7 + $0x1e8] sm:$0xff] }
  0xa3   :  { %1079 = vmatpush1.bf16.xpose.msra.mxu1 %v1078_v39  ;;  %v1098_v39 = vpack.c.bf16 %v134_v33, %v132_v30  ;;  %v152_v30 = vld [vmem:[#allocation5 + $0x2e0] sm:$0xff]  ;;  %v154_v33 = vld [vmem:[#allocation5 + $0x2f0] sm:$0xff] }
  0xa4   :  { %1081 = vmatprep.subr.bf16.mxu1 %v1080_v41  ;;  %v1100_v41 = vpack.c.bf16 %v139_v37, %v137_v36  ;;  %v157_v36 = vld [vmem:[#allocation5 + $0x308] sm:$0xff]  ;;  %v159_v37 = vld [vmem:[#allocation5 + $0x318] sm:$0xff] }
  0xa7   :  { %1207 = vmatpush1.bf16.xpose.msra.mxu0 %v1206_v50  ;;  %v1290_v50 = vpack.c.bf16 %v336_v44, %v332_v43  ;;  %v372_v43 = vld [vmem:[#allocation7 + $0x1c0] sm:$0xff] }
  0xa8   :  { %1209 = vmatprep.subr.bf16.mxu0 %v1208_v52  ;;  %v1292_v52 = vpack.c.bf16 %v345_v47, %v341_v46  ;;  %v376_v44 = vld [vmem:[#allocation7 + $0x1e0] sm:$0xff]  ;;  %v381_v46 = vld [vmem:[#allocation7 + $0x208] sm:$0xff] }
  0xa9   :  { %v385_v47 = vld [vmem:[#allocation7 + $0x228] sm:$0xff] }
  0xab   :  { %1083 = vmatpush1.bf16.xpose.msra.mxu1 %v1082_v51  ;;  %v1102_v51 = vpack.c.bf16 %v138_v45, %v136_v42  ;;  %v156_v42 = vld [vmem:[#allocation5 + $0x300] sm:$0xff]  ;;  %v158_v45 = vld [vmem:[#allocation5 + $0x310] sm:$0xff] }
  0xac   :  { %1085 = vmatprep.subr.bf16.mxu1 %v1084_v53  ;;  %v1104_v53 = vpack.c.bf16 %v143_v49, %v141_v48  ;;  %v161_v48 = vld [vmem:[#allocation5 + $0x328] sm:$0xff]  ;;  %v163_v49 = vld [vmem:[#allocation5 + $0x338] sm:$0xff] }
  0xaf   :  { %1211 = vmatpush1.bf16.xpose.msra.mxu0 %v1210_v62  ;;  %v1294_v62 = vpack.c.bf16 %v344_v56, %v340_v55  ;;  %v380_v55 = vld [vmem:[#allocation7 + $0x200] sm:$0xff] }
  0xb0   :  { %1213 = vmatprep.subr.bf16.mxu0 %v1212_v0  ;;  %v1296_v0 = vpack.c.bf16 %v353_v59, %v349_v58  ;;  %v384_v56 = vld [vmem:[#allocation7 + $0x220] sm:$0xff]  ;;  %v389_v58 = vld [vmem:[#allocation7 + $0x248] sm:$0xff] }
  0xb1   :  { %v393_v59 = vld [vmem:[#allocation7 + $0x268] sm:$0xff] }
  0xb3   :  { %1087 = vmatpush1.bf16.xpose.msra.mxu1 %v1086_v63  ;;  %v1106_v63 = vpack.c.bf16 %v142_v57, %v140_v54  ;;  %v160_v54 = vld [vmem:[#allocation5 + $0x320] sm:$0xff]  ;;  %v162_v57 = vld [vmem:[#allocation5 + $0x330] sm:$0xff] }
  0xb4   :  { %1089 = vmatprep.subr.bf16.mxu1 %v1088_v1  ;;  %v1108_v1 = vpack.c.bf16 %v147_v61, %v145_v60  ;;  %v165_v60 = vld [vmem:[#allocation5 + $0x348] sm:$0xff]  ;;  %v167_v61 = vld [vmem:[#allocation5 + $0x358] sm:$0xff] }
  0xb7   :  { %1215 = vmatpush1.bf16.xpose.msra.mxu0 %v1214_v11  ;;  %v1298_v11 = vpack.c.bf16 %v352_v5, %v348_v4  ;;  %v388_v4 = vld [vmem:[#allocation7 + $0x240] sm:$0xff] }
  0xb8   :  { %1281 = vmatprep.subr.bf16.mxu0 %v1280_v16  ;;  %v1112_v16 = vpack.c.bf16 %v151_v10, %v149_v9  ;;  %v392_v5 = vld [vmem:[#allocation7 + $0x260] sm:$0xff]  ;;  %v169_v9 = vld [vmem:[#allocation5 + $0x368] sm:$0xff]  ;;  %v171_v10 = vld [vmem:[#allocation5 + $0x378] sm:$0xff] }
  0xba   :  { %509 = vmatmul.mubr.f32.vlgmr.msra.gmra.mrb[0].mxu1 %v1627_v12 }
  0xbb   :  { %1091 = vmatpush1.bf16.xpose.msra.mxu1 %v1090_v13  ;;  %514 = vmatprep.mubr.f32.mxu1 %v1629_v15  ;;  %v1110_v13 = vpack.c.bf16 %v146_v6, %v144_v3  ;;  %v164_v3 = vld [vmem:[#allocation5 + $0x340] sm:$0xff]  ;;  %v166_v6 = vld [vmem:[#allocation5 + $0x350] sm:$0xff] }
  0xbc   :  { %1093 = vmatprep.subr.bf16.mxu1 %v1092_v14  ;;  %v1300_v14 = vpack.c.bf16 %v361_v8, %v357_v7  ;;  %v397_v7 = vld [vmem:[#allocation7 + $0x288] sm:$0xff] }
  0xbd   :  { %v401_v8 = vld [vmem:[#allocation7 + $0x2a8] sm:$0xff] }
  0xbe   :  { %515 = vmatmul.mubr.f32.gmra.mrb[2].mxu1 %v1633_v18  ;;  %663 = vmatmul.mubr.f32.vlgmr.msra.gmra.mrb[0].mxu0 %v1627_v12 }
  0xbf   :  { %585 = vmatprep.mubr.f32.mxu1 %v1623_v2  ;;  %668 = vmatprep.mubr.f32.mxu0 %v1629_v15 }
  0xc0   :  { %1283 = vmatpush1.bf16.xpose.msra.mxu0 %v1282_v26  ;;  %v1302_v26 = vpack.c.bf16 %v360_v20, %v356_v19  ;;  %v396_v19 = vld [vmem:[#allocation7 + $0x280] sm:$0xff] }
  0xc1   :  { %1285 = vmatprep.subr.bf16.mxu0 %v1284_v28  ;;  %v1304_v28 = vpack.c.bf16 %v369_v23, %v365_v22  ;;  %v400_v20 = vld [vmem:[#allocation7 + $0x2a0] sm:$0xff]  ;;  %v405_v22 = vld [vmem:[#allocation7 + $0x2c8] sm:$0xff] }
  0xc2   :  { %669 = vmatmul.mubr.f32.gmra.mrb[2].mxu0 %v1633_v18  ;;  %v409_v23 = vld [vmem:[#allocation7 + $0x2e8] sm:$0xff] }
  0xc3   :  { %1095 = vmatpush1.bf16.xpose.msra.mxu1 %v1094_v27  ;;  %v1114_v27 = vpack.c.bf16 %v150_v21, %v148_v17  ;;  %v168_v17 = vld [vmem:[#allocation5 + $0x360] sm:$0xff]  ;;  %v170_v21 = vld [vmem:[#allocation5 + $0x370] sm:$0xff] }
  0xc4   :  { %1097 = vmatprep.subr.bf16.mxu1 %v1096_v29  ;;  %v1116_v29 = vpack.c.bf16 %v155_v25, %v153_v24  ;;  %v173_v24 = vld [vmem:[#allocation5 + $0x388] sm:$0xff]  ;;  %v175_v25 = vld [vmem:[#allocation5 + $0x398] sm:$0xff] }
  0xc8   :  { %1287 = vmatpush1.bf16.xpose.msra.mxu0 %v1286_v38  ;;  %v1306_v38 = vpack.c.bf16 %v368_v32, %v364_v31  ;;  %v404_v31 = vld [vmem:[#allocation7 + $0x2c0] sm:$0xff] }
  0xc9   :  { %1289 = vmatprep.subr.bf16.mxu0 %v1288_v40  ;;  %v1308_v40 = vpack.c.bf16 %v377_v35, %v373_v34  ;;  %v408_v32 = vld [vmem:[#allocation7 + $0x2e0] sm:$0xff]  ;;  %v413_v34 = vld [vmem:[#allocation7 + $0x308] sm:$0xff] }
  0xca   :  { %v417_v35 = vld [vmem:[#allocation7 + $0x328] sm:$0xff] }
  0xcb   :  { %1099 = vmatpush1.bf16.xpose.msra.mxu1 %v1098_v39  ;;  %v1118_v39 = vpack.c.bf16 %v154_v33, %v152_v30  ;;  %v172_v30 = vld [vmem:[#allocation5 + $0x380] sm:$0xff]  ;;  %v174_v33 = vld [vmem:[#allocation5 + $0x390] sm:$0xff] }
  0xcc   :  { %1101 = vmatprep.subr.bf16.mxu1 %v1100_v41  ;;  %v1120_v41 = vpack.c.bf16 %v159_v37, %v157_v36  ;;  %v177_v36 = vld [vmem:[#allocation5 + $0x3a8] sm:$0xff]  ;;  %v179_v37 = vld [vmem:[#allocation5 + $0x3b8] sm:$0xff] }
  0xd0   :  { %1291 = vmatpush1.bf16.xpose.msra.mxu0 %v1290_v50  ;;  %v1310_v50 = vpack.c.bf16 %v376_v44, %v372_v43  ;;  %v412_v43 = vld [vmem:[#allocation7 + $0x300] sm:$0xff] }
  0xd1   :  { %1293 = vmatprep.subr.bf16.mxu0 %v1292_v52  ;;  %v1312_v52 = vpack.c.bf16 %v385_v47, %v381_v46  ;;  %v416_v44 = vld [vmem:[#allocation7 + $0x320] sm:$0xff]  ;;  %v421_v46 = vld [vmem:[#allocation7 + $0x348] sm:$0xff] }
  0xd2   :  { %v425_v47 = vld [vmem:[#allocation7 + $0x368] sm:$0xff] }
  0xd3   :  { %1103 = vmatpush1.bf16.xpose.msra.mxu1 %v1102_v51  ;;  %v1122_v51 = vpack.c.bf16 %v158_v45, %v156_v42  ;;  %v176_v42 = vld [vmem:[#allocation5 + $0x3a0] sm:$0xff]  ;;  %v178_v45 = vld [vmem:[#allocation5 + $0x3b0] sm:$0xff] }
  0xd4   :  { %1105 = vmatprep.subr.bf16.mxu1 %v1104_v53  ;;  %v1124_v53 = vpack.c.bf16 %v163_v49, %v161_v48  ;;  %v181_v48 = vld [vmem:[#allocation5 + $0x3c8] sm:$0xff]  ;;  %v183_v49 = vld [vmem:[#allocation5 + $0x3d8] sm:$0xff] }
  0xd8   :  { %1295 = vmatpush1.bf16.xpose.msra.mxu0 %v1294_v62  ;;  %v1314_v62 = vpack.c.bf16 %v384_v56, %v380_v55  ;;  %v420_v55 = vld [vmem:[#allocation7 + $0x340] sm:$0xff] }
  0xd9   :  { %1297 = vmatprep.subr.bf16.mxu0 %v1296_v0  ;;  %v1316_v0 = vpack.c.bf16 %v393_v59, %v389_v58  ;;  %v424_v56 = vld [vmem:[#allocation7 + $0x360] sm:$0xff]  ;;  %v429_v58 = vld [vmem:[#allocation7 + $0x388] sm:$0xff] }
  0xda   :  { %v433_v59 = vld [vmem:[#allocation7 + $0x3a8] sm:$0xff] }
  0xdb   :  { %1107 = vmatpush1.bf16.xpose.msra.mxu1 %v1106_v63  ;;  %v1126_v63 = vpack.c.bf16 %v162_v57, %v160_v54  ;;  %v180_v54 = vld [vmem:[#allocation5 + $0x3c0] sm:$0xff]  ;;  %v182_v57 = vld [vmem:[#allocation5 + $0x3d0] sm:$0xff] }
  0xdc   :  { %1109 = vmatprep.subr.bf16.mxu1 %v1108_v1  ;;  %v1128_v1 = vpack.c.bf16 %v167_v61, %v165_v60  ;;  %v185_v60 = vld [vmem:[#allocation5 + $0x3e8] sm:$0xff]  ;;  %v187_v61 = vld [vmem:[#allocation5 + $0x3f8] sm:$0xff] }
  0xe0   :  { %1299 = vmatpush1.bf16.xpose.msra.mxu0 %v1298_v11  ;;  %v1318_v11 = vpack.c.bf16 %v392_v5, %v388_v4  ;;  %v428_v4 = vld [vmem:[#allocation7 + $0x380] sm:$0xff] }
  0xe1   :  { %1301 = vmatprep.subr.bf16.mxu0 %v1300_v14  ;;  %v1320_v14 = vpack.c.bf16 %v401_v8, %v397_v7  ;;  %v432_v5 = vld [vmem:[#allocation7 + $0x3a0] sm:$0xff]  ;;  %v437_v7 = vld [vmem:[#allocation7 + $0x3c8] sm:$0xff] }
  0xe2   :  { %v441_v8 = vld [vmem:[#allocation7 + $0x3e8] sm:$0xff] }
  0xe3   :  { %1111 = vmatpush1.bf16.xpose.msra.mxu1 %v1110_v13  ;;  %v1130_v13 = vpack.c.bf16 %v166_v6, %v164_v3  ;;  %v184_v3 = vld [vmem:[#allocation5 + $0x3e0] sm:$0xff]  ;;  %v186_v6 = vld [vmem:[#allocation5 + $0x3f0] sm:$0xff] }
  0xe4   :  { %1113 = vmatprep.subr.bf16.mxu1 %v1112_v16  ;;  %v1132_v16 = vpack.c.bf16 %v171_v10, %v169_v9  ;;  %v253_v9 = vld [vmem:[#allocation5 + $0x608] sm:$0xff]  ;;  %v255_v10 = vld [vmem:[#allocation5 + $0x618] sm:$0xff] }
  0xe8   :  { %1303 = vmatpush1.bf16.xpose.msra.mxu0 %v1302_v26  ;;  %v1322_v26 = vpack.c.bf16 %v400_v20, %v396_v19  ;;  %v440_v19 = vld [vmem:[#allocation7 + $0x3e0] sm:$0xff] }
  0xe9   :  { %1305 = vmatprep.subr.bf16.mxu0 %v1304_v28  ;;  %v1324_v28 = vpack.c.bf16 %v409_v23, %v405_v22  ;;  %v252_v20 = vld [vmem:[#allocation5 + $0x600] sm:$0xff]  ;;  %v257_v22 = vld [vmem:[#allocation5 + $0x628] sm:$0xff]  ;;  %v259_v23 = vld [vmem:[#allocation5 + $0x638] sm:$0xff] }
  0xeb   :  { %1115 = vmatpush1.bf16.xpose.msra.mxu1 %v1114_v27  ;;  %v1134_v27 = vpack.c.bf16 %v170_v21, %v168_v17  ;;  %v436_v17 = vld [vmem:[#allocation7 + $0x3c0] sm:$0xff]  ;;  %v254_v21 = vld [vmem:[#allocation5 + $0x610] sm:$0xff] }
  0xec   :  { %1117 = vmatprep.subr.bf16.mxu1 %v1116_v29  ;;  %v1136_v29 = vpack.c.bf16 %v175_v25, %v173_v24  ;;  %v1342_v24 = vpack.c.bf16 %v440_v19, %v436_v17  ;;  %v1218_v25 = vpack.c.bf16 %v254_v21, %v252_v20  ;;  %v292_v20 = vld [vmem:[#allocation5 + $0x740] sm:$0xff]  ;;  %v294_v21 = vld [vmem:[#allocation5 + $0x750] sm:$0xff] }
  0xf0   :  { %1307 = vmatpush1.bf16.xpose.msra.mxu0 %v1306_v38  ;;  %v1326_v38 = vpack.c.bf16 %v408_v32, %v404_v31 }
  0xf1   :  { %1309 = vmatprep.subr.bf16.mxu0 %v1308_v40  ;;  %v1328_v40 = vpack.c.bf16 %v417_v35, %v413_v34  ;;  %v262_v34 = vld [vmem:[#allocation5 + $0x650] sm:$0xff]  ;;  %v265_v35 = vld [vmem:[#allocation5 + $0x668] sm:$0xff] }
  0xf3   :  { %1119 = vmatpush1.bf16.xpose.msra.mxu1 %v1118_v39  ;;  %v1138_v39 = vpack.c.bf16 %v174_v33, %v172_v30  ;;  %v263_v30 = vld [vmem:[#allocation5 + $0x658] sm:$0xff]  ;;  %v260_v33 = vld [vmem:[#allocation5 + $0x640] sm:$0xff] }
  0xf4   :  { %1121 = vmatprep.subr.bf16.mxu1 %v1120_v41  ;;  %v1140_v41 = vpack.c.bf16 %v179_v37, %v177_v36  ;;  %v267_v36 = vld [vmem:[#allocation5 + $0x678] sm:$0xff]  ;;  %v1226_v37 = vpack.c.bf16 %v262_v34, %v260_v33 }
  0xf8   :  { %1311 = vmatpush1.bf16.xpose.msra.mxu0 %v1310_v50  ;;  %v1330_v50 = vpack.c.bf16 %v416_v44, %v412_v43 }
  0xf9   :  { %1313 = vmatprep.subr.bf16.mxu0 %v1312_v52  ;;  %v1332_v52 = vpack.c.bf16 %v425_v47, %v421_v46  ;;  %v273_v46 = vld [vmem:[#allocation5 + $0x6a8] sm:$0xff]  ;;  %v275_v47 = vld [vmem:[#allocation5 + $0x6b8] sm:$0xff] }
  0xfb   :  { %1123 = vmatpush1.bf16.xpose.msra.mxu1 %v1122_v51  ;;  %v1142_v51 = vpack.c.bf16 %v178_v45, %v176_v42  ;;  %v271_v42 = vld [vmem:[#allocation5 + $0x698] sm:$0xff]  ;;  %v270_v45 = vld [vmem:[#allocation5 + $0x690] sm:$0xff] }
  0xfc   :  { %1125 = vmatprep.subr.bf16.mxu1 %v1124_v53  ;;  %v1144_v53 = vpack.c.bf16 %v183_v49, %v181_v48  ;;  %v1236_v49 = vpack.c.bf16 %v275_v47, %v273_v46  ;;  %v300_v46 = vld [vmem:[#allocation5 + $0x780] sm:$0xff]  ;;  %v302_v47 = vld [vmem:[#allocation5 + $0x790] sm:$0xff] }
 0x100   :  { %1315 = vmatpush1.bf16.xpose.msra.mxu0 %v1314_v62  ;;  %v1334_v62 = vpack.c.bf16 %v424_v56, %v420_v55  ;;  %v276_v56 = vld [vmem:[#allocation5 + $0x6c0] sm:$0xff] }
 0x101   :  { %1317 = vmatprep.subr.bf16.mxu0 %v1316_v0  ;;  %v1336_v0 = vpack.c.bf16 %v433_v59, %v429_v58  ;;  %v281_v58 = vld [vmem:[#allocation5 + $0x6e8] sm:$0xff]  ;;  %v283_v59 = vld [vmem:[#allocation5 + $0x6f8] sm:$0xff] }
 0x103   :  { %1127 = vmatpush1.bf16.xpose.msra.mxu1 %v1126_v63  ;;  %v1146_v63 = vpack.c.bf16 %v182_v57, %v180_v54  ;;  %v278_v57 = vld [vmem:[#allocation5 + $0x6d0] sm:$0xff] }
 0x104   :  { %1129 = vmatprep.subr.bf16.mxu1 %v1128_v1  ;;  %v1148_v1 = vpack.c.bf16 %v187_v61, %v185_v60  ;;  %v1242_v60 = vpack.c.bf16 %v278_v57, %v276_v56  ;;  %v1244_v61 = vpack.c.bf16 %v283_v59, %v281_v58 }
 0x108   :  { %1319 = vmatpush1.bf16.xpose.msra.mxu0 %v1318_v11  ;;  %v1338_v11 = vpack.c.bf16 %v432_v5, %v428_v4  ;;  %v284_v5 = vld [vmem:[#allocation5 + $0x700] sm:$0xff] }
 0x109   :  { %1321 = vmatprep.subr.bf16.mxu0 %v1320_v14  ;;  %v1340_v14 = vpack.c.bf16 %v441_v8, %v437_v7  ;;  %v289_v7 = vld [vmem:[#allocation5 + $0x728] sm:$0xff]  ;;  %v291_v8 = vld [vmem:[#allocation5 + $0x738] sm:$0xff] }
 0x10b   :  { %1131 = vmatpush1.bf16.xpose.msra.mxu1 %v1130_v13  ;;  %v1150_v13 = vpack.c.bf16 %v186_v6, %v184_v3  ;;  %v286_v6 = vld [vmem:[#allocation5 + $0x710] sm:$0xff] }
 0x10c   :  { %1133 = vmatprep.subr.bf16.mxu1 %v1132_v16  ;;  %v1216_v16 = vpack.c.bf16 %v255_v10, %v253_v9  ;;  %v1250_v9 = vpack.c.bf16 %v286_v6, %v284_v5  ;;  %v1252_v10 = vpack.c.bf16 %v291_v8, %v289_v7 }
 0x110   :  { %1323 = vmatpush1.bf16.xpose.msra.mxu0 %v1322_v26  ;;  %v1220_v26 = vpack.c.bf16 %v259_v23, %v257_v22  ;;  %v297_v22 = vld [vmem:[#allocation5 + $0x768] sm:$0xff]  ;;  %v299_v23 = vld [vmem:[#allocation5 + $0x778] sm:$0xff] }
 0x111   :  { %1325 = vmatprep.subr.bf16.mxu0 %v1324_v28  ;;  %v258_v28 = vld [vmem:[#allocation5 + $0x630] sm:$0xff] }
 0x113   :  { %1135 = vmatpush1.bf16.xpose.msra.mxu1 %v1134_v27  ;;  %v256_v27 = vld [vmem:[#allocation5 + $0x620] sm:$0xff] }
 0x114   :  { %1137 = vmatprep.subr.bf16.mxu1 %v1136_v29  ;;  %v261_v29 = vld [vmem:[#allocation5 + $0x648] sm:$0xff]  ;;  %v1222_v31 = vpack.c.bf16 %v258_v28, %v256_v27  ;;  %v298_v27 = vld [vmem:[#allocation5 + $0x770] sm:$0xff] }
 0x115   :  { %v1224_v32 = vpack.c.bf16 %v263_v30, %v261_v29  ;;  %v301_v29 = vld [vmem:[#allocation5 + $0x788] sm:$0xff]  ;;  %v303_v30 = vld [vmem:[#allocation5 + $0x798] sm:$0xff] }
 0x118   :  { %1327 = vmatpush1.bf16.xpose.msra.mxu0 %v1326_v38  ;;  %v1228_v38 = vpack.c.bf16 %v267_v36, %v265_v35  ;;  %v319_v35 = vld [vmem:[#allocation7 + $0x18] sm:$0xff] }
 0x119   :  { %1329 = vmatprep.subr.bf16.mxu0 %v1328_v40  ;;  %v266_v40 = vld [vmem:[#allocation5 + $0x670] sm:$0xff]  ;;  %v323_v36 = vld [vmem:[#allocation7 + $0x38] sm:$0xff] }
 0x11b   :  { %1139 = vmatpush1.bf16.xpose.msra.mxu1 %v1138_v39  ;;  %v264_v39 = vld [vmem:[#allocation5 + $0x660] sm:$0xff] }
 0x11c   :  { %1141 = vmatprep.subr.bf16.mxu1 %v1140_v41  ;;  %v269_v41 = vld [vmem:[#allocation5 + $0x688] sm:$0xff]  ;;  %v1230_v43 = vpack.c.bf16 %v266_v40, %v264_v39  ;;  %v1344_v39 = vpack.c.bf16 %v323_v36, %v319_v35 }
 0x11d   :  { %v1232_v44 = vpack.c.bf16 %v271_v42, %v269_v41 }
 0x120   :  { %1331 = vmatpush1.bf16.xpose.msra.mxu0 %v1330_v50  ;;  %v272_v50 = vld [vmem:[#allocation5 + $0x6a0] sm:$0xff] }
 0x121   :  { %1333 = vmatprep.subr.bf16.mxu0 %v1332_v52  ;;  %v277_v52 = vld [vmem:[#allocation5 + $0x6c8] sm:$0xff] }
 0x123   :  { %1143 = vmatpush1.bf16.xpose.msra.mxu1 %v1142_v51  ;;  %v274_v51 = vld [vmem:[#allocation5 + $0x6b0] sm:$0xff] }
 0x124   :  { %1145 = vmatprep.subr.bf16.mxu1 %v1144_v53  ;;  %v279_v53 = vld [vmem:[#allocation5 + $0x6d8] sm:$0xff]  ;;  %v1238_v54 = vpack.c.bf16 %v274_v51, %v272_v50  ;;  %v305_v50 = vld [vmem:[#allocation5 + $0x7a8] sm:$0xff] }
 0x125   :  { %v1240_v55 = vpack.c.bf16 %v279_v53, %v277_v52  ;;  %v307_v51 = vld [vmem:[#allocation5 + $0x7b8] sm:$0xff] }
 0x126   :  { %v1268_v57 = vpack.c.bf16 %v307_v51, %v305_v50  ;;  %v330_v51 = vld [vmem:[#allocation7 + $0x70] sm:$0xff] }
 0x128   :  { %1335 = vmatpush1.bf16.xpose.msra.mxu0 %v1334_v62  ;;  %v280_v62 = vld [vmem:[#allocation5 + $0x6e0] sm:$0xff] }
 0x129   :  { %1337 = vmatprep.subr.bf16.mxu0 %v1336_v0  ;;  %v285_v0 = vld [vmem:[#allocation5 + $0x708] sm:$0xff] }
 0x12b   :  { %1147 = vmatpush1.bf16.xpose.msra.mxu1 %v1146_v63  ;;  %v282_v63 = vld [vmem:[#allocation5 + $0x6f0] sm:$0xff] }
 0x12c   :  { %1149 = vmatprep.subr.bf16.mxu1 %v1148_v1  ;;  %v287_v1 = vld [vmem:[#allocation5 + $0x718] sm:$0xff]  ;;  %v1246_v3 = vpack.c.bf16 %v282_v63, %v280_v62  ;;  %v309_v62 = vld [vmem:[#allocation5 + $0x7c8] sm:$0xff] }
 0x12d   :  { %v1248_v4 = vpack.c.bf16 %v287_v1, %v285_v0  ;;  %v311_v63 = vld [vmem:[#allocation5 + $0x7d8] sm:$0xff] }
 0x12e   :  { %v1272_v6 = vpack.c.bf16 %v311_v63, %v309_v62  ;;  %v351_v62 = vld [vmem:[#allocation7 + $0x118] sm:$0xff] }
 0x130   :  { %1339 = vmatpush1.bf16.xpose.msra.mxu0 %v1338_v11  ;;  %v288_v11 = vld [vmem:[#allocation5 + $0x720] sm:$0xff] }
 0x131   :  { %1341 = vmatprep.subr.bf16.mxu0 %v1340_v14  ;;  %v293_v14 = vld [vmem:[#allocation5 + $0x748] sm:$0xff] }
 0x133   :  { %1151 = vmatpush1.bf16.xpose.msra.mxu1 %v1150_v13  ;;  %v290_v13 = vld [vmem:[#allocation5 + $0x730] sm:$0xff] }
 0x134   :  { %1217 = vmatprep.subr.bf16.mxu1 %v1216_v16  ;;  %v295_v16 = vld [vmem:[#allocation5 + $0x758] sm:$0xff]  ;;  %v1254_v17 = vpack.c.bf16 %v290_v13, %v288_v11  ;;  %v310_v11 = vld [vmem:[#allocation5 + $0x7d0] sm:$0xff] }
 0x135   :  { %v1256_v19 = vpack.c.bf16 %v295_v16, %v293_v14  ;;  %v313_v14 = vld [vmem:[#allocation5 + $0x7e8] sm:$0xff]  ;;  %v315_v16 = vld [vmem:[#allocation5 + $0x7f8] sm:$0xff] }
 0x138   :  { %1343 = vmatpush1.bf16.xpose.msra.mxu0 %v1342_v24  ;;  %v1258_v24 = vpack.c.bf16 %v294_v21, %v292_v20 }
 0x139   :  { %1345 = vmatprep.subr.bf16.mxu0 %v1344_v39  ;;  %v331_v39 = vld [vmem:[#allocation7 + $0x78] sm:$0xff] }
 0x13a   :  { %586 = vmatmul.mubr.f32.vlgmr.msra.gmra.mrb[4].mxu1 %v1627_v12 }
 0x13b   :  { %1219 = vmatpush1.bf16.xpose.msra.mxu1 %v1218_v25  ;;  %591 = vmatprep.mubr.f32.mxu1 %v1629_v15  ;;  %v1260_v25 = vpack.c.bf16 %v299_v23, %v297_v22  ;;  %v312_v23 = vld [vmem:[#allocation5 + $0x7e0] sm:$0xff] }
 0x13c   :  { %1221 = vmatprep.subr.bf16.mxu1 %v1220_v26  ;;  %v296_v26 = vld [vmem:[#allocation5 + $0x760] sm:$0xff] }
 0x13d   :  { %v1262_v34 = vpack.c.bf16 %v298_v27, %v296_v26 }
 0x13e   :  { %592 = vmatmul.mubr.f32.gmra.mrb[6].mxu1 %v1633_v18 }
 0x13f   :  { %739 = vmatprep.mubr.f32.mxu1 %v1623_v2  ;;  %v268_v2 = vld [vmem:[#allocation5 + $0x680] sm:$0xff] }
 0x140   :  { %v1234_v48 = vpack.c.bf16 %v270_v45, %v268_v2 }
 0x143   :  { %1223 = vmatpush1.bf16.xpose.msra.mxu1 %v1222_v31 }
 0x144   :  { %1225 = vmatprep.subr.bf16.mxu1 %v1224_v32 }
 0x14b   :  { %1227 = vmatpush1.bf16.xpose.msra.mxu1 %v1226_v37 }
 0x14c   :  { %1229 = vmatprep.subr.bf16.mxu1 %v1228_v38  ;;  %v1264_v38 = vpack.c.bf16 %v303_v30, %v301_v29 }
 0x153   :  { %1231 = vmatpush1.bf16.xpose.msra.mxu1 %v1230_v43 }
 0x154   :  { %1233 = vmatprep.subr.bf16.mxu1 %v1232_v44 }
 0x15b   :  { %1235 = vmatpush1.bf16.xpose.msra.mxu1 %v1234_v48 }
 0x15c   :  { %1237 = vmatprep.subr.bf16.mxu1 %v1236_v49 }
 0x163   :  { %1239 = vmatpush1.bf16.xpose.msra.mxu1 %v1238_v54 }
 0x164   :  { %1241 = vmatprep.subr.bf16.mxu1 %v1240_v55  ;;  %v1266_v55 = vpack.c.bf16 %v302_v47, %v300_v46 }
 0x16b   :  { %1243 = vmatpush1.bf16.xpose.msra.mxu1 %v1242_v60  ;;  %v304_v60 = vld [vmem:[#allocation5 + $0x7a0] sm:$0xff] }
 0x16c   :  { %1245 = vmatprep.subr.bf16.mxu1 %v1244_v61  ;;  %v306_v61 = vld [vmem:[#allocation5 + $0x7b0] sm:$0xff] }
 0x173   :  { %1247 = vmatpush1.bf16.xpose.msra.mxu1 %v1246_v3 }
 0x174   :  { %1249 = vmatprep.subr.bf16.mxu1 %v1248_v4  ;;  %v1270_v4 = vpack.c.bf16 %v306_v61, %v304_v60  ;;  %v342_v60 = vld [vmem:[#allocation7 + $0xd0] sm:$0xff] }
 0x175   :  { %v346_v61 = vld [vmem:[#allocation7 + $0xf0] sm:$0xff] }
 0x176   :  { %v1358_v63 = vpack.c.bf16 %v346_v61, %v342_v60  ;;  %v422_v60 = vld [vmem:[#allocation7 + $0x350] sm:$0xff] }
 0x177   :  { %v426_v61 = vld [vmem:[#allocation7 + $0x370] sm:$0xff] }
 0x17b   :  { %1251 = vmatpush1.bf16.xpose.msra.mxu1 %v1250_v9 }
 0x17c   :  { %1253 = vmatprep.subr.bf16.mxu1 %v1252_v10  ;;  %v308_v10 = vld [vmem:[#allocation5 + $0x7c0] sm:$0xff] }
 0x183   :  { %1255 = vmatpush1.bf16.xpose.msra.mxu1 %v1254_v17  ;;  %v1274_v17 = vpack.c.bf16 %v310_v11, %v308_v10 }
 0x184   :  { %1257 = vmatprep.subr.bf16.mxu1 %v1256_v19  ;;  %v1276_v19 = vpack.c.bf16 %v315_v16, %v313_v14  ;;  %v370_v14 = vld [vmem:[#allocation7 + $0x1b0] sm:$0xff]  ;;  %v375_v16 = vld [vmem:[#allocation7 + $0x1d8] sm:$0xff] }
 0x18b   :  { %1259 = vmatpush1.bf16.xpose.msra.mxu1 %v1258_v24  ;;  %v314_v24 = vld [vmem:[#allocation5 + $0x7f0] sm:$0xff] }
 0x18c   :  { %1261 = vmatprep.subr.bf16.mxu1 %v1260_v25 }
 0x18d   :  { %v1644_v28 = vpop.f32.mrb[0].mxu1 }
 0x18e   :  { %v752_v31 = vand.u32 2147483647, %v1644_v28  ;;  %v1647_v32 = vpop.f32.mrb[1].mxu1  ;;  %vm808_vm0 = vcmp.ge.f32.partialorder %v1644_v28, 0.0 }
 0x18f   :  { %v753_v33 = vand.u32 2147483647, %v1647_v32  ;;  %vm809_vm1 = vcmp.ge.f32.partialorder %v1647_v32, 0.0 }
 0x190   :  { %v760_v37 = vsub.f32 0.0, %v752_v31  ;;  %v1278_v31 = vpack.c.bf16 %v314_v24, %v312_v23  ;;  %v383_v23 = vld [vmem:[#allocation7 + $0x218] sm:$0xff] }
 0x191   :  { %v761_v40 = vsub.f32 0.0, %v753_v33  ;;  %v1650_v41 = vpop.f32.mrb[2].mxu1  ;;  %v1656_v48 = vpop.f32.mrb[0].mxu0  ;;  %v318_v33 = vld [vmem:[#allocation7 + $0x10] sm:$0xff]  ;;  %v387_v24 = vld [vmem:[#allocation7 + $0x238] sm:$0xff] }
 0x192   :  { %v768_v42 = vmul.f32 1.442695, %v760_v37  ;;  %v756_v43 = vand.u32 2147483647, %v1650_v41  ;;  %v1653_v44 = vpop.f32.mrb[3].mxu1  ;;  %v1658_v52 = vpop.f32.mrb[1].mxu0 }
 0x193   :  { %v770_v2 = vmul.f32 1.442695, %v761_v40  ;;  %1263 = vmatpush1.bf16.xpose.msra.mxu1 %v1262_v34  ;;  %v757_v45 = vand.u32 2147483647, %v1653_v44  ;;  %vm812_vm2 = vcmp.ge.f32.partialorder %v1650_v41, 0.0  ;;  %v322_v34 = vld [vmem:[#allocation7 + $0x30] sm:$0xff] }
 0x194   :  { %1420 = vpow2.f32 %v768_v42  ;;  %1265 = vmatprep.subr.bf16.mxu1 %v1264_v38  ;;  %v764_v49 = vsub.f32 0.0, %v756_v43  ;;  %vm813_vm3 = vcmp.ge.f32.partialorder %v1653_v44, 0.0  ;;  %v327_v38 = vld [vmem:[#allocation7 + $0x58] sm:$0xff] }
 0x195   :  { %1422 = vpow2.f32 %v770_v2  ;;  %v765_v53 = vsub.f32 0.0, %v757_v45  ;;  %v1660_v58 = vpop.f32.mrb[2].mxu0  ;;  %v1346_v2 = vpack.c.bf16 %v322_v34, %v318_v33  ;;  %v1348_v47 = vpack.c.bf16 %v331_v39, %v327_v38  ;;  %v403_v38 = vld [vmem:[#allocation7 + $0x2b8] sm:$0xff] }
 0x196   :  { %v776_v54 = vmul.f32 1.442695, %v764_v49  ;;  %v1662_v59 = vpop.f32.mrb[3].mxu0 }
 0x197   :  { %v778_v56 = vmul.f32 1.442695, %v765_v53  ;;  %v339_v53 = vld [vmem:[#allocation7 + $0xb8] sm:$0xff] }
 0x198   :  { %1424 = vpow2.f32 %v776_v54 }
 0x199   :  { %1426 = vpow2.f32 %v778_v56  ;;  %v343_v56 = vld [vmem:[#allocation7 + $0xd8] sm:$0xff] }
 0x19b   :  { %1267 = vmatpush1.bf16.xpose.msra.mxu1 %v1266_v55  ;;  %v338_v55 = vld [vmem:[#allocation7 + $0xb0] sm:$0xff] }
 0x19c   :  { %1269 = vmatprep.subr.bf16.mxu1 %v1268_v57  ;;  %v347_v57 = vld [vmem:[#allocation7 + $0xf8] sm:$0xff] }
 0x19e   :  { %v1421_v0 = vpop.eup %1420 }
 0x19f   :  { %v1423_v1 = vpop.eup %1422  ;;  %v784_v3 = vadd.f32 1.0, %v1421_v0 }
 0x1a0   :  { %v785_v5 = vadd.f32 1.0, %v1423_v1 }
 0x1a1   :  { %1428 = vrcp.f32 %v784_v3  ;;  %v363_v3 = vld [vmem:[#allocation7 + $0x178] sm:$0xff] }
 0x1a2   :  { %v1425_v7 = vpop.eup %1424  ;;  %1430 = vrcp.f32 %v785_v5 }
 0x1a3   :  { %v1427_v8 = vpop.eup %1426  ;;  %1271 = vmatpush1.bf16.xpose.msra.mxu1 %v1270_v4  ;;  %v788_v9 = vadd.f32 1.0, %v1425_v7 }
 0x1a4   :  { %1273 = vmatprep.subr.bf16.mxu1 %v1272_v6  ;;  %v789_v13 = vadd.f32 1.0, %v1427_v8  ;;  %v358_v6 = vld [vmem:[#allocation7 + $0x150] sm:$0xff] }
 0x1a5   :  { %1432 = vrcp.f32 %v788_v9  ;;  %v371_v9 = vld [vmem:[#allocation7 + $0x1b8] sm:$0xff] }
 0x1a6   :  { %1434 = vrcp.f32 %v789_v13  ;;  %v366_v13 = vld [vmem:[#allocation7 + $0x190] sm:$0xff] }
 0x1ab   :  { %v1429_v20 = vpop.eup %1428  ;;  %1275 = vmatpush1.bf16.xpose.msra.mxu1 %v1274_v17  ;;  %v379_v17 = vld [vmem:[#allocation7 + $0x1f8] sm:$0xff] }
 0x1ac   :  { %v1431_v21 = vpop.eup %1430  ;;  %v816_v22 = vmul.f32 %v1429_v20, %v1421_v0  ;;  %1277 = vmatprep.subr.bf16.mxu1 %v1276_v19  ;;  %v1370_v19 = vpack.c.bf16 %v370_v14, %v366_v13 }
 0x1ad   :  { %v817_v25 = vmul.f32 %v1431_v21, %v1423_v1  ;;  %v359_v1 = vld [vmem:[#allocation7 + $0x158] sm:$0xff] }
 0x1ae   :  { %v824_v26 = vsel %vm808_vm0, %v1429_v20, %v816_v22  ;;  %v1364_v5 = vpack.c.bf16 %v363_v3, %v359_v1  ;;  %v1372_v20 = vpack.c.bf16 %v379_v17, %v375_v16  ;;  %v378_v22 = vld [vmem:[#allocation7 + $0x1f0] sm:$0xff]  ;;  %v439_v1 = vld [vmem:[#allocation7 + $0x3d8] sm:$0xff] }
 0x1af   :  { %v1433_v27 = vpop.eup %1432  ;;  %v832_v29 = vmul.f32 %v824_v26, %v1644_v28  ;;  %v825_v30 = vsel %vm809_vm1, %v1431_v21, %v817_v25  ;;  %v374_v21 = vld [vmem:[#allocation7 + $0x1d0] sm:$0xff]  ;;  %v1376_v26 = vpack.c.bf16 %v387_v24, %v383_v23  ;;  %v443_v3 = vld [vmem:[#allocation7 + $0x3f8] sm:$0xff] }
 0x1b0   :  { %v1435_v35 = vpop.eup %1434  ;;  %v833_v36 = vmul.f32 %v825_v30, %v1647_v32  ;;  %v820_v37 = vmul.f32 %v1433_v27, %v1425_v7  ;;  %v362_v7 = vld [vmem:[#allocation7 + $0x170] sm:$0xff]  ;;  %v1374_v25 = vpack.c.bf16 %v378_v22, %v374_v21  ;;  %v391_v30 = vld [vmem:[#allocation7 + $0x258] sm:$0xff] }
 0x1b1   :  { %v840_v40 = vmul.f32 %v832_v29, %v1656_v48  ;;  %v821_v42 = vmul.f32 %v1435_v35, %v1427_v8  ;;  %v326_v48 = vld [vmem:[#allocation7 + $0x50] sm:$0xff]  ;;  %v367_v8 = vld [vmem:[#allocation7 + $0x198] sm:$0xff]  ;;  %v1366_v10 = vpack.c.bf16 %v362_v7, %v358_v6 }
 0x1b2   :  { %v841_v43 = vmul.f32 %v833_v36, %v1658_v52  ;;  %v828_v28 = vsel %vm812_vm2, %v1433_v27, %v820_v37  ;;  %v335_v52 = vld [vmem:[#allocation7 + $0x98] sm:$0xff]  ;;  %v1368_v11 = vpack.c.bf16 %v371_v9, %v367_v8  ;;  %v382_v27 = vld [vmem:[#allocation7 + $0x210] sm:$0xff] }
 0x1b3   :  { %1279 = vmatpush1.bf16.xpose.msra.mxu1 %v1278_v31  ;;  %v836_v45 = vmul.f32 %v828_v28, %v1650_v41  ;;  %v829_v46 = vsel %vm813_vm3, %v1435_v35, %v821_v42  ;;  %v1350_v41 = vpack.c.bf16 %v330_v51, %v326_v48  ;;  %v1352_v54 = vpack.c.bf16 %v339_v53, %v335_v52  ;;  %v386_v29 = vld [vmem:[#allocation7 + $0x230] sm:$0xff]  ;;  %v395_v31 = vld [vmem:[#allocation7 + $0x278] sm:$0xff] }
 0x1b4   :  { %912 = vmatprep.mubr.f32.mxu0 %v841_v43  ;;  %v837_v32 = vmul.f32 %v829_v46, %v1653_v44  ;;  %v334_v44 = vld [vmem:[#allocation7 + $0x90] sm:$0xff]  ;;  %v1378_v33 = vpack.c.bf16 %v386_v29, %v382_v27  ;;  %v1380_v34 = vpack.c.bf16 %v395_v31, %v391_v30  ;;  %v399_v37 = vld [vmem:[#allocation7 + $0x298] sm:$0xff] }
 0x1b5   :  { %913 = vmatmul.mubr.f32.vlgmr.msra.gmra.mrb[4].mxu0 %v840_v40  ;;  %v844_v49 = vmul.f32 %v836_v45, %v1660_v58  ;;  %v1354_v58 = vpack.c.bf16 %v338_v55, %v334_v44  ;;  %v390_v35 = vld [vmem:[#allocation7 + $0x250] sm:$0xff]  ;;  %v1384_v40 = vpack.c.bf16 %v403_v38, %v399_v37  ;;  %v407_v28 = vld [vmem:[#allocation7 + $0x2d8] sm:$0xff] }
 0x1b6   :  { %v845_v50 = vmul.f32 %v837_v32, %v1662_v59  ;;  %1347 = vmatpush1.bf16.xpose.msra.mxu0 %v1346_v2  ;;  %v1356_v59 = vpack.c.bf16 %v347_v57, %v343_v56  ;;  %v394_v36 = vld [vmem:[#allocation7 + $0x270] sm:$0xff]  ;;  %v411_v2 = vld [vmem:[#allocation7 + $0x2f8] sm:$0xff] }
 0x1b7   :  { %1349 = vmatprep.subr.bf16.mxu0 %v1348_v47  ;;  %v1382_v39 = vpack.c.bf16 %v394_v36, %v390_v35  ;;  %v398_v42 = vld [vmem:[#allocation7 + $0x290] sm:$0xff]  ;;  %v1388_v46 = vpack.c.bf16 %v411_v2, %v407_v28  ;;  %v423_v44 = vld [vmem:[#allocation7 + $0x358] sm:$0xff] }
 0x1b8   :  { %918 = vmatprep.mubr.f32.mxu0 %v845_v50  ;;  %v402_v43 = vld [vmem:[#allocation7 + $0x2b0] sm:$0xff]  ;;  %v419_v50 = vld [vmem:[#allocation7 + $0x338] sm:$0xff] }
 0x1b9   :  { %919 = vmatmul.mubr.f32.gmra.mrb[6].mxu0 %v844_v49  ;;  %v1386_v45 = vpack.c.bf16 %v402_v43, %v398_v42  ;;  %v406_v47 = vld [vmem:[#allocation7 + $0x2d0] sm:$0xff]  ;;  %v415_v49 = vld [vmem:[#allocation7 + $0x318] sm:$0xff] }
 0x1ba   :  { %740 = vmatmul.mubr.f32.vlgmr.msra.gmra.mrb[8].mxu1 %v1627_v12  ;;  %v355_v12 = vld [vmem:[#allocation7 + $0x138] sm:$0xff]  ;;  %v410_v32 = vld [vmem:[#allocation7 + $0x2f0] sm:$0xff]  ;;  %v1392_v51 = vpack.c.bf16 %v419_v50, %v415_v49 }
 0x1bb   :  { %745 = vmatprep.mubr.f32.mxu1 %v1629_v15  ;;  %v1360_v0 = vpack.c.bf16 %v355_v12, %v351_v62  ;;  %v350_v15 = vld [vmem:[#allocation7 + $0x110] sm:$0xff]  ;;  %v1390_v48 = vpack.c.bf16 %v410_v32, %v406_v47  ;;  %v427_v55 = vld [vmem:[#allocation7 + $0x378] sm:$0xff] }
 0x1bc   :  { %v431_v62 = vld [vmem:[#allocation7 + $0x398] sm:$0xff]  ;;  %v438_v6 = vld [vmem:[#allocation7 + $0x3d0] sm:$0xff] }
 0x1bd   :  { %v435_v12 = vld [vmem:[#allocation7 + $0x3b8] sm:$0xff]  ;;  %v442_v7 = vld [vmem:[#allocation7 + $0x3f0] sm:$0xff] }
 0x1be   :  { %746 = vmatmul.mubr.f32.gmra.mrb[10].mxu1 %v1633_v18  ;;  %1351 = vmatpush1.bf16.xpose.msra.mxu0 %v1350_v41  ;;  %v354_v18 = vld [vmem:[#allocation7 + $0x130] sm:$0xff]  ;;  %v1406_v8 = vpack.c.bf16 %v442_v7, %v438_v6 }
 0x1bf   :  { %1353 = vmatprep.subr.bf16.mxu0 %v1352_v54  ;;  %v1362_v4 = vpack.c.bf16 %v354_v18, %v350_v15  ;;  %v414_v41 = vld [vmem:[#allocation7 + $0x310] sm:$0xff] }
 0x1c0   :  { %v418_v54 = vld [vmem:[#allocation7 + $0x330] sm:$0xff] }
 0x1c1   :  { %v430_v15 = vld [vmem:[#allocation7 + $0x390] sm:$0xff] }
 0x1c2   :  { %v434_v18 = vld [vmem:[#allocation7 + $0x3b0] sm:$0xff] }
 0x1c6   :  { %1355 = vmatpush1.bf16.xpose.msra.mxu0 %v1354_v58  ;;  %v1394_v58 = vpack.c.bf16 %v418_v54, %v414_v41 }
 0x1c7   :  { %1357 = vmatprep.subr.bf16.mxu0 %v1356_v59  ;;  %v1396_v59 = vpack.c.bf16 %v427_v55, %v423_v44 }
 0x1ce   :  { %1359 = vmatpush1.bf16.xpose.msra.mxu0 %v1358_v63  ;;  %v1398_v63 = vpack.c.bf16 %v426_v61, %v422_v60 }
 0x1cf   :  { %1361 = vmatprep.subr.bf16.mxu0 %v1360_v0  ;;  %v1400_v0 = vpack.c.bf16 %v435_v12, %v431_v62 }
 0x1d6   :  { %1363 = vmatpush1.bf16.xpose.msra.mxu0 %v1362_v4  ;;  %v1402_v4 = vpack.c.bf16 %v434_v18, %v430_v15 }
 0x1d7   :  { %1365 = vmatprep.subr.bf16.mxu0 %v1364_v5  ;;  %v1404_v5 = vpack.c.bf16 %v443_v3, %v439_v1 }
 0x1de   :  { %1367 = vmatpush1.bf16.xpose.msra.mxu0 %v1366_v10 }
 0x1df   :  { %1369 = vmatprep.subr.bf16.mxu0 %v1368_v11 }
 0x1e6   :  { %1371 = vmatpush1.bf16.xpose.msra.mxu0 %v1370_v19 }
 0x1e7   :  { %1373 = vmatprep.subr.bf16.mxu0 %v1372_v20 }
 0x1ee   :  { %1375 = vmatpush1.bf16.xpose.msra.mxu0 %v1374_v25 }
 0x1ef   :  { %1377 = vmatprep.subr.bf16.mxu0 %v1376_v26 }
 0x1f6   :  { %1379 = vmatpush1.bf16.xpose.msra.mxu0 %v1378_v33 }
 0x1f7   :  { %1381 = vmatprep.subr.bf16.mxu0 %v1380_v34 }
 0x1fe   :  { %1383 = vmatpush1.bf16.xpose.msra.mxu0 %v1382_v39 }
 0x1ff   :  { %1385 = vmatprep.subr.bf16.mxu0 %v1384_v40 }
 0x206   :  { %1387 = vmatpush1.bf16.xpose.msra.mxu0 %v1386_v45 }
 0x207   :  { %1389 = vmatprep.subr.bf16.mxu0 %v1388_v46 }
 0x20d   :  { %v1679_v52 = vpop.f32.mrb[4].mxu1 }
 0x20e   :  { %v1681_v53 = vpop.f32.mrb[5].mxu1  ;;  %1391 = vmatpush1.bf16.xpose.msra.mxu0 %v1390_v48  ;;  %v754_v9 = vand.u32 2147483647, %v1679_v52  ;;  %vm810_vm4 = vcmp.ge.f32.partialorder %v1679_v52, 0.0 }
 0x20f   :  { %1393 = vmatprep.subr.bf16.mxu0 %v1392_v51  ;;  %v755_v10 = vand.u32 2147483647, %v1681_v53  ;;  %vm811_vm5 = vcmp.ge.f32.partialorder %v1681_v53, 0.0 }
 0x210   :  { %v762_v11 = vsub.f32 0.0, %v754_v9 }
 0x211   :  { %v1683_v56 = vpop.f32.mrb[6].mxu1  ;;  %v763_v14 = vsub.f32 0.0, %v755_v10 }
 0x212   :  { %v1685_v57 = vpop.f32.mrb[7].mxu1  ;;  %v758_v13 = vand.u32 2147483647, %v1683_v56  ;;  %v772_v17 = vmul.f32 1.442695, %v762_v11  ;;  %vm814_vm6 = vcmp.ge.f32.partialorder %v1683_v56, 0.0 }
 0x213   :  { %v759_v16 = vand.u32 2147483647, %v1685_v57  ;;  %v774_v20 = vmul.f32 1.442695, %v763_v14  ;;  %vm815_vm7 = vcmp.ge.f32.partialorder %v1685_v57, 0.0 }
 0x214   :  { %v766_v19 = vsub.f32 0.0, %v758_v13  ;;  %1436 = vpow2.f32 %v772_v17 }
 0x215   :  { %v767_v21 = vsub.f32 0.0, %v759_v16  ;;  %1438 = vpow2.f32 %v774_v20 }
 0x216   :  { %1395 = vmatpush1.bf16.xpose.msra.mxu0 %v1394_v58  ;;  %v780_v22 = vmul.f32 1.442695, %v766_v19 }
 0x217   :  { %1397 = vmatprep.subr.bf16.mxu0 %v1396_v59  ;;  %v782_v23 = vmul.f32 1.442695, %v767_v21 }
 0x218   :  { %1440 = vpow2.f32 %v780_v22 }
 0x219   :  { %1442 = vpow2.f32 %v782_v23 }
 0x21e   :  { %1399 = vmatpush1.bf16.xpose.msra.mxu0 %v1398_v63  ;;  %v1437_v24 = vpop.eup %1436 }
 0x21f   :  { %1401 = vmatprep.subr.bf16.mxu0 %v1400_v0  ;;  %v1439_v25 = vpop.eup %1438  ;;  %v786_v26 = vadd.f32 1.0, %v1437_v24 }
 0x220   :  { %v787_v29 = vadd.f32 1.0, %v1439_v25 }
 0x221   :  { %1444 = vrcp.f32 %v786_v26 }
 0x222   :  { %v1441_v27 = vpop.eup %1440  ;;  %1446 = vrcp.f32 %v787_v29 }
 0x223   :  { %v1443_v30 = vpop.eup %1442  ;;  %v790_v31 = vadd.f32 1.0, %v1441_v27 }
 0x224   :  { %v791_v33 = vadd.f32 1.0, %v1443_v30 }
 0x225   :  { %1448 = vrcp.f32 %v790_v31 }
 0x226   :  { %1403 = vmatpush1.bf16.xpose.msra.mxu0 %v1402_v4  ;;  %1450 = vrcp.f32 %v791_v33 }
 0x227   :  { %1405 = vmatprep.subr.bf16.mxu0 %v1404_v5 }
 0x22b   :  { %v1445_v34 = vpop.eup %1444 }
 0x22c   :  { %v1447_v35 = vpop.eup %1446  ;;  %v818_v36 = vmul.f32 %v1445_v34, %v1437_v24 }
 0x22d   :  { %v819_v38 = vmul.f32 %v1447_v35, %v1439_v25 }
 0x22e   :  { %1407 = vmatpush1.bf16.xpose.msra.mxu0 %v1406_v8  ;;  %v826_v40 = vsel %vm810_vm4, %v1445_v34, %v818_v36 }
 0x22f   :  { %v1449_v37 = vpop.eup %1448  ;;  %v827_v43 = vsel %vm811_vm5, %v1447_v35, %v819_v38  ;;  %v834_v2 = vmul.f32 %v826_v40, %v1679_v52 }
 0x230   :  { %v1451_v39 = vpop.eup %1450  ;;  %v822_v42 = vmul.f32 %v1449_v37, %v1441_v27  ;;  %v835_v46 = vmul.f32 %v827_v43, %v1681_v53 }
 0x231   :  { %v823_v28 = vmul.f32 %v1451_v39, %v1443_v30 }
 0x232   :  { %v830_v47 = vsel %vm814_vm6, %v1449_v37, %v822_v42 }
 0x233   :  { %v831_v50 = vsel %vm815_vm7, %v1451_v39, %v823_v28  ;;  %v838_v51 = vmul.f32 %v830_v47, %v1683_v56 }
 0x234   :  { %v839_v54 = vmul.f32 %v831_v50, %v1685_v57 }
 0x28d   :  { %v741_v45 = vpop.f32.mrb[8].mxu1 }
 0x28e   :  { %v842_v32 = vmul.f32 %v834_v2, %v741_v45  ;;  %v743_v49 = vpop.f32.mrb[9].mxu1 }
 0x28f   :  { %v843_v48 = vmul.f32 %v835_v46, %v743_v49 }
 0x291   :  { %v747_v41 = vpop.f32.mrb[10].mxu1  ;;  %989 = vmatprep.mubr.f32.mxu0 %v843_v48 }
 0x292   :  { %v846_v44 = vmul.f32 %v838_v51, %v747_v41  ;;  %v749_v55 = vpop.f32.mrb[11].mxu1  ;;  %990 = vmatmul.mubr.f32.vlgmr.msra.gmra.mrb[4].mxu0 %v842_v32 }
 0x293   :  { %v847_v58 = vmul.f32 %v839_v54, %v749_v55 }
 0x295   :  { %995 = vmatprep.mubr.f32.mxu0 %v847_v58 }
 0x296   :  { %996 = vmatmul.mubr.f32.gmra.mrb[6].mxu0 %v846_v44 }
 0x365   :  { %v991_v52 = vpop.f32.mrb[4].mxu0 }
 0x366   :  { %1002 = vst [vmem:[#allocation8] sm:$0xff] %v991_v52  ;;  %v993_v53 = vpop.f32.mrb[5].mxu0 }
 0x367   :  { %1003 = vst [vmem:[#allocation8 + $0x8] sm:$0xff] %v993_v53 }
 0x369   :  { %v997_v59 = vpop.f32.mrb[6].mxu0 }
 0x36a   :  { %1004 = vst [vmem:[#allocation8 + $0x10] sm:$0xff] %v997_v59  ;;  %v999_v56 = vpop.f32.mrb[7].mxu0 }
 0x36b   :  { %1005 = vst [vmem:[#allocation8 + $0x18] sm:$0xff] %v999_v56 }
 0x36c   :  { %1529 = shalt.err (!%p1526_p0)
}
 0x36d   :  { %s1530_s29 = scalar_lea.hbm %s1717_s3, 512 }
 0x36e   :  { %p1531_p1 = scmp.ne.s32.totalorder %s1717_s3, %s1530_s29  ;;  %p1534_p2 = scmp.lt.u32.totalorder %s1530_s29, %s1717_s3 }
 0x370   :  { %p1536_p3 = pnand %p1534_p2, %p1531_p1 }
 0x372   :  { %1539 = shalt.err (!%p1536_p3)
}
 0x373   :  { %1017 = dma.vmem_to_hbm [thread:$0]  %s1012_s23, 512, %s1717_s3, [#allocation4], %s1548_s24, %s1548_s24, %s1549_s25  }
 0x374   :  { %1544 = dma.done.wait [#allocation4], 512  }
 0x375   :  { %1545 = vsyncadd [#allocation4], 4294966784 }
 0x376   :  { %1021 = vsyncpa [#allocation3], 1 }
 0x377   :  { %1022 = vsyncpa [#allocation6], 1 }
 0x378   :  { %1023 = vsyncpa [#allocation4], 1 }

</bundles_post_ra>
